<compile_context>
chip_gen: v5e
topology: v5e:2x2
jax: 0.10.0
libtpu: 0.0.40
codegen_flags: <defaults>
</compile_context>

<pallas_src>
import numpy as np
import jax
import jax.numpy as jnp
from jax.experimental import pallas as pl
from jax.experimental.pallas import tpu as pltpu


def _round_up(x, m):
    return (x + m - 1) // m * m


# ----------------------------- fused RDB kernel -----------------------------

def make_rdb_kernel(C_pad, G_pad, num_layers, H, W, group_bases):
    HW = H * W
    taps = [(t // 3, t % 3) for t in range(9)]   # tap t -> (dy, dx)

    def kernel(*refs):
        # refs: x, w_0..w_{L-1}, wf, out, patch_scratch
        x_ref = refs[0]
        w_refs = refs[1:1 + num_layers]
        wf_ref = refs[1 + num_layers]
        o_ref = refs[2 + num_layers]
        patch_ref = refs[3 + num_layers]

        f32 = jnp.float32

        # ---- per-tap border-validity masks (in-register zero padding) -------
        pos = jax.lax.broadcasted_iota(jnp.int32, (1, HW), 1)   # flat = h*W + w
        if (W & (W - 1)) == 0:
            col = jnp.bitwise_and(pos, W - 1)                   # w = flat % W
        else:
            col = pos % W

        def tap_mask(dy, dx):
            conds = []
            if dy == 0:
                conds.append(pos >= W)                # needs row h-1 >= 0
            if dy == 2:
                conds.append(pos < (H - 1) * W)       # needs row h+1 <= H-1
            if dx == 0:
                conds.append(col >= 1)                # needs col w-1 >= 0
            if dx == 2:
                conds.append(col <= W - 2)            # needs col w+1 <= W-1
            if not conds:
                return None
            m = conds[0]
            for c in conds[1:]:
                m = m & c
            return m

        masks = [tap_mask(dy, dx) for dy, dx in taps]

        # ---- incremental im2col: roll/mask ONE group into the patch ---------
        def write_group(block, base, n):
            # block: (n, HW) unshifted features of this group (f32).
            for t, (dy, dx) in enumerate(taps):
                off = (dy - 1) * W + (dx - 1)          # flat neighbour offset
                # out[:, p] = block[:, p + off]   (pltpu.roll == jnp.roll)
                sh = block if off == 0 else pltpu.roll(block, (-off) % HW, axis=1)
                if masks[t] is not None:
                    sh = jnp.where(masks[t], sh, 0.0)
                patch_ref[base + t * n: base + (t + 1) * n, :] = (
                    sh.astype(patch_ref.dtype))

        x0 = x_ref[0].astype(f32)                      # (C_pad, HW), incl. 1-chan
        write_group(x0, group_bases[0], C_pad)

        # ---- dense 3x3 conv + ReLU layers (biases folded into the weights) --
        for li in range(num_layers):
            k_li = group_bases[li + 1]                 # patch rows of groups 0..li
            acc = jnp.dot(w_refs[li][...], patch_ref[0:k_li, :],
                          preferred_element_type=f32)  # (G_pad, HW)
            acc = jnp.maximum(acc, 0.0)
            write_group(acc, group_bases[li + 1], G_pad)

        # ---- 1x1 local feature fusion (bias folded) + residual --------------
        # Center-tap rows of each group are the unshifted features.
        centers = [patch_ref[4 * C_pad:5 * C_pad, :]]
        for li in range(num_layers):
            b = group_bases[li + 1]
            centers.append(patch_ref[b + 4 * G_pad: b + 5 * G_pad, :])
        feats = jnp.concatenate(centers, axis=0)       # (C_pad + L*G_pad, HW)
        out = jnp.dot(wf_ref[...], feats, preferred_element_type=f32) + x0
        o_ref[0] = out.astype(o_ref.dtype)

    return kernel


# ----------------------------- wrapper ---------------------------------------

def rdb_forward(x_nchw, params, compute_dtype=jnp.float32):
    """Matches RDB.forward; input/output are NCHW like the PyTorch module."""
    N, C, H, W = x_nchw.shape
    num_layers = len(params["layers"])
    G = params["layers"][0][0].shape[-1]
    HW = H * W

    dsize = jnp.dtype(compute_dtype).itemsize
    sub = (8 * 4) // dsize                    # sublane tile rows (8 f32 / 16 bf16)

    # Channel padding to the sublane tile; one spare input channel is a
    # constant-1 channel that carries every folded bias.
    C_pad = _round_up(C + 1, sub)
    G_pad = _round_up(G, sub)
    ones_ch = C                               # padded index of the 1-channel

    group_sizes = [C_pad] + [G_pad] * num_layers
    group_bases = [0]
    for s in group_sizes:
        group_bases.append(group_bases[-1] + 9 * s)
    K_tot = group_bases[-1]                   # = 9 * (C_pad + L*G_pad)
    Ctot_pad = C_pad + num_layers * G_pad
    Ctot = C + num_layers * G

    # Patch-column index of real feature channel r at tap t (tap-major within
    # each group, group-major across groups) — must match write_group().
    def col_index(r, t):
        if r < C:
            grp, local, n = 0, r, C_pad
        else:
            grp = 1 + (r - C) // G
            local = (r - C) % G
            n = G_pad
        return group_bases[grp] + t * n + local

    # Row index of real channel r in the concatenated center-tap feature stack.
    def feat_index(r):
        if r < C:
            return r
        return C_pad + ((r - C) // G) * G_pad + (r - C) % G

    ones_bias_col = 4 * C_pad + ones_ch       # center tap of the 1-channel

    # ---- host-side weight packing (biases folded in) -------------------------
    packed_ws = []
    for li, (w, b) in enumerate(params["layers"]):
        cin = C + li * G
        K_li = group_bases[li + 1]
        w_np = np.asarray(w)                  # (3, 3, cin, G) HWIO
        b_np = np.asarray(b).reshape(G)
        w_p = np.zeros((G_pad, K_li), np.float32)
        for t in range(9):
            dy, dx = t // 3, t % 3
            for r in range(cin):
                w_p[:G, col_index(r, t)] = w_np[dy, dx, r, :]
        w_p[:G, ones_bias_col] = b_np         # folded conv bias
        packed_ws.append(jnp.asarray(w_p, dtype=compute_dtype))

    wf, bf = params["fusion"]                 # (Ctot, C), (1, C)
    wf_np = np.asarray(wf)
    bf_np = np.asarray(bf).reshape(C)
    wf_p = np.zeros((C_pad, Ctot_pad), np.float32)
    for r in range(Ctot):
        wf_p[:C, feat_index(r)] = wf_np[r, :]
    wf_p[:C, ones_ch] = bf_np                 # folded fusion bias
    wf_packed = jnp.asarray(wf_p, dtype=compute_dtype)

    # ---- input packing: NCHW -> (N, C_pad, H*W) with [x | 1 | 0...] channels --
    x_flat = x_nchw.reshape(N, C, HW)
    x_pad = jnp.concatenate(
        [x_flat,
         jnp.ones((N, 1, HW), x_nchw.dtype),
         jnp.zeros((N, C_pad - C - 1, HW), x_nchw.dtype)], axis=1)

    # ---- specs / resource accounting -----------------------------------------
    in_specs = [pl.BlockSpec((1, C_pad, HW), lambda n: (n, 0, 0))]
    args = [x_pad]
    for w_p in packed_ws:
        in_specs.append(pl.BlockSpec(w_p.shape, lambda n: (0, 0)))
        args.append(w_p)
    in_specs.append(pl.BlockSpec(wf_packed.shape, lambda n: (0, 0)))
    args.append(wf_packed)

    xsize = x_nchw.dtype.itemsize
    weight_bytes = (sum(int(w.size) for w in packed_ws) + int(wf_packed.size)) * dsize
    vmem_need = (K_tot * HW * dsize               # patch scratch
                 + 2 * 2 * C_pad * HW * xsize     # double-buffered x / out blocks
                 + 2 * weight_bytes)              # (conservatively) buffered weights
    vmem_limit = int(min(max(2 * vmem_need, 8 << 20), 48 << 20))

    flops = 2 * HW * N * (sum(G_pad * group_bases[li + 1] for li in range(num_layers))
                          + C_pad * Ctot_pad)
    bytes_accessed = 2 * N * C_pad * HW * xsize + weight_bytes

    kernel = make_rdb_kernel(C_pad, G_pad, num_layers, H, W, group_bases)
    out_pad = pl.pallas_call(
        kernel,
        out_shape=jax.ShapeDtypeStruct((N, C_pad, HW), x_nchw.dtype),
        grid=(N,),
        in_specs=in_specs,
        out_specs=pl.BlockSpec((1, C_pad, HW), lambda n: (n, 0, 0)),
        scratch_shapes=[pltpu.VMEM((K_tot, HW), compute_dtype)],  # im2col patch
        compiler_params=pltpu.CompilerParams(
            dimension_semantics=("parallel",),
            vmem_limit_bytes=vmem_limit,
        ),
        cost_estimate=pl.CostEstimate(
            flops=int(flops), transcendentals=0,
            bytes_accessed=int(bytes_accessed)),
    )(*args)
    return out_pad[:, :C, :].reshape(N, C, H, W)


# ----------------------------- params & reference ----------------------------

def init_rdb_params(key, in_channels, growth_rate, num_layers):
    params = {"layers": [], "fusion": None}
    for i in range(num_layers):
        key, kw, kb = jax.random.split(key, 3)
        cin = in_channels + i * growth_rate
        w = jax.random.normal(kw, (3, 3, cin, growth_rate), jnp.float32) * 0.1
        b = jax.random.normal(kb, (1, growth_rate), jnp.float32) * 0.05
        params["layers"].append((w, b))
    key, kw, kb = jax.random.split(key, 3)
    ctot = in_channels + num_layers * growth_rate
    wf = jax.random.normal(kw, (ctot, in_channels), jnp.float32) * 0.1
    bf = jax.random.normal(kb, (1, in_channels), jnp.float32) * 0.05
    params["fusion"] = (wf, bf)
    return params


def rdb_reference(x_nchw, params):
    """Pure-JAX reference (lax.conv) for correctness checking."""
    x = jnp.transpose(x_nchw, (0, 2, 3, 1))
    feats = x
    for (w, b) in params["layers"]:
        out = jax.lax.conv_general_dilated(
            feats, w, (1, 1), "SAME",
            dimension_numbers=("NHWC", "HWIO", "NHWC")) + b
        out = jnp.maximum(out, 0.0)
        feats = jnp.concatenate([feats, out], axis=-1)
    wf, bf = params["fusion"]
    y = jax.lax.conv_general_dilated(
        feats, wf[None, None], (1, 1), "SAME",
        dimension_numbers=("NHWC", "HWIO", "NHWC")) + bf
    y = y + x
    return jnp.transpose(y, (0, 3, 1, 2))


if __name__ == "__main__":
    in_channels, growth_rate, num_layers = 4, 4, 3
    N, H, W = 2, 16, 16

    key = jax.random.PRNGKey(0)
    key, kx = jax.random.split(key)
    x = jax.random.normal(kx, (N, in_channels, H, W), jnp.float32)   # NCHW input
    params = init_rdb_params(key, in_channels, growth_rate, num_layers)

    out = jax.block_until_ready(rdb_forward(x, params))
    ref = jax.block_until_ready(rdb_reference(x, params))

    assert out.shape == (N, in_channels, H, W)
    assert jnp.allclose(out, ref, atol=1e-4, rtol=1e-4), "mismatch vs reference"

    print("KERNEL_OK")
</pallas_src>

<mosaic_0001>
module attributes {stable_mosaic.version = 11 : i64} {
  func.func @kernel(%arg0: i32, %arg1: memref<1x8x256xf32, #tpu.memory_space<vmem>>, %arg2: memref<8x72xf32, #tpu.memory_space<vmem>>, %arg3: memref<8x144xf32, #tpu.memory_space<vmem>>, %arg4: memref<8x216xf32, #tpu.memory_space<vmem>>, %arg5: memref<8x32xf32, #tpu.memory_space<vmem>>, %arg6: memref<1x8x256xf32, #tpu.memory_space<vmem>>, %arg7: memref<288x256xf32, #tpu.memory_space<vmem>>) attributes {dimension_semantics = [#tpu.dimension_semantics<parallel>], iteration_bounds = array<i64: 2>, scalar_prefetch = 0 : i64, scratch_operands = 1 : i64, tpu.core_type = #tpu.core_type<tc>, window_params = [{transform_indices = @transform_0, window_bounds = array<i64: 1, 8, 256>}, {pipeline_mode = #tpu.pipeline_mode<synchronous>, transform_indices = @transform_1, window_bounds = array<i64: 8, 72>}, {pipeline_mode = #tpu.pipeline_mode<synchronous>, transform_indices = @transform_2, window_bounds = array<i64: 8, 144>}, {pipeline_mode = #tpu.pipeline_mode<synchronous>, transform_indices = @transform_3, window_bounds = array<i64: 8, 216>}, {pipeline_mode = #tpu.pipeline_mode<synchronous>, transform_indices = @transform_4, window_bounds = array<i64: 8, 32>}, {transform_indices = @transform_5, window_bounds = array<i64: 1, 8, 256>}]} {
    %0 = tpu.iota {dimensions = array<i32: 1>} : vector<1x256xi32>
    %c15_i32 = arith.constant 15 : i32
    %1 = vector.broadcast %c15_i32 : i32 to vector<1x256xi32>
    %2 = arith.andi %0, %1 : vector<1x256xi32>
    %c16_i32 = arith.constant 16 : i32
    %3 = vector.broadcast %c16_i32 : i32 to vector<1x256xi32>
    %4 = arith.cmpi sge, %0, %3 : vector<1x256xi32>
    %c1_i32 = arith.constant 1 : i32
    %5 = vector.broadcast %c1_i32 : i32 to vector<1x256xi32>
    %6 = arith.cmpi sge, %2, %5 : vector<1x256xi32>
    %7 = arith.andi %4, %6 : vector<1x256xi1>
    %c16_i32_0 = arith.constant 16 : i32
    %8 = vector.broadcast %c16_i32_0 : i32 to vector<1x256xi32>
    %9 = arith.cmpi sge, %0, %8 : vector<1x256xi32>
    %c16_i32_1 = arith.constant 16 : i32
    %10 = vector.broadcast %c16_i32_1 : i32 to vector<1x256xi32>
    %11 = arith.cmpi sge, %0, %10 : vector<1x256xi32>
    %c14_i32 = arith.constant 14 : i32
    %12 = vector.broadcast %c14_i32 : i32 to vector<1x256xi32>
    %13 = arith.cmpi sle, %2, %12 : vector<1x256xi32>
    %14 = arith.andi %11, %13 : vector<1x256xi1>
    %c1_i32_2 = arith.constant 1 : i32
    %15 = vector.broadcast %c1_i32_2 : i32 to vector<1x256xi32>
    %16 = arith.cmpi sge, %2, %15 : vector<1x256xi32>
    %c14_i32_3 = arith.constant 14 : i32
    %17 = vector.broadcast %c14_i32_3 : i32 to vector<1x256xi32>
    %18 = arith.cmpi sle, %2, %17 : vector<1x256xi32>
    %c240_i32 = arith.constant 240 : i32
    %19 = vector.broadcast %c240_i32 : i32 to vector<1x256xi32>
    %20 = arith.cmpi slt, %0, %19 : vector<1x256xi32>
    %c1_i32_4 = arith.constant 1 : i32
    %21 = vector.broadcast %c1_i32_4 : i32 to vector<1x256xi32>
    %22 = arith.cmpi sge, %2, %21 : vector<1x256xi32>
    %23 = arith.andi %20, %22 : vector<1x256xi1>
    %c240_i32_5 = arith.constant 240 : i32
    %24 = vector.broadcast %c240_i32_5 : i32 to vector<1x256xi32>
    %25 = arith.cmpi slt, %0, %24 : vector<1x256xi32>
    %c240_i32_6 = arith.constant 240 : i32
    %26 = vector.broadcast %c240_i32_6 : i32 to vector<1x256xi32>
    %27 = arith.cmpi slt, %0, %26 : vector<1x256xi32>
    %c14_i32_7 = arith.constant 14 : i32
    %28 = vector.broadcast %c14_i32_7 : i32 to vector<1x256xi32>
    %29 = arith.cmpi sle, %2, %28 : vector<1x256xi32>
    %30 = arith.andi %27, %29 : vector<1x256xi1>
    %c0 = arith.constant 0 : index
    %c0_8 = arith.constant 0 : index
    %c0_9 = arith.constant 0 : index
    %31 = vector.load %arg1[%c0, %c0_8, %c0_9] : memref<1x8x256xf32, #tpu.memory_space<vmem>>, vector<1x8x256xf32>
    %32 = vector.shape_cast %31 : vector<1x8x256xf32> to vector<8x256xf32>
    %c17_i32 = arith.constant 17 : i32
    %33 = tpu.dynamic_rotate %32 by %c17_i32 dim 1 : vector<8x256xf32>, i32 -> vector<8x256xf32>
    %cst = arith.constant 0.000000e+00 : f32
    %34 = vector.shape_cast %7 : vector<1x256xi1> to vector<1x256xi1>
    %35 = vector.broadcast %34 : vector<1x256xi1> to vector<8x256xi1>
    %36 = vector.broadcast %cst : f32 to vector<8x256xf32>
    %37 = arith.select %35, %33, %36 : vector<8x256xi1>, vector<8x256xf32>
    %c0_10 = arith.constant 0 : index
    %c0_11 = arith.constant 0 : index
    %38 = vector.load %arg7[%c0_10, %c0_11] : memref<288x256xf32, #tpu.memory_space<vmem>>, vector<8x256xf32>
    tpu.vector_store %arg7[%c0_10, %c0_11], %37 {strides = array<i32>} : memref<288x256xf32, #tpu.memory_space<vmem>>, vector<8x256xf32>,
    %c16_i32_12 = arith.constant 16 : i32
    %39 = tpu.dynamic_rotate %32 by %c16_i32_12 dim 1 : vector<8x256xf32>, i32 -> vector<8x256xf32>
    %cst_13 = arith.constant 0.000000e+00 : f32
    %40 = vector.shape_cast %9 : vector<1x256xi1> to vector<1x256xi1>
    %41 = vector.broadcast %40 : vector<1x256xi1> to vector<8x256xi1>
    %42 = vector.broadcast %cst_13 : f32 to vector<8x256xf32>
    %43 = arith.select %41, %39, %42 : vector<8x256xi1>, vector<8x256xf32>
    %c8 = arith.constant 8 : index
    %c0_14 = arith.constant 0 : index
    %44 = vector.load %arg7[%c8, %c0_14] : memref<288x256xf32, #tpu.memory_space<vmem>>, vector<8x256xf32>
    tpu.vector_store %arg7[%c8, %c0_14], %43 {strides = array<i32>} : memref<288x256xf32, #tpu.memory_space<vmem>>, vector<8x256xf32>,
    %c15_i32_15 = arith.constant 15 : i32
    %45 = tpu.dynamic_rotate %32 by %c15_i32_15 dim 1 : vector<8x256xf32>, i32 -> vector<8x256xf32>
    %cst_16 = arith.constant 0.000000e+00 : f32
    %46 = vector.shape_cast %14 : vector<1x256xi1> to vector<1x256xi1>
    %47 = vector.broadcast %46 : vector<1x256xi1> to vector<8x256xi1>
    %48 = vector.broadcast %cst_16 : f32 to vector<8x256xf32>
    %49 = arith.select %47, %45, %48 : vector<8x256xi1>, vector<8x256xf32>
    %c16 = arith.constant 16 : index
    %c0_17 = arith.constant 0 : index
    %50 = vector.load %arg7[%c16, %c0_17] : memref<288x256xf32, #tpu.memory_space<vmem>>, vector<8x256xf32>
    tpu.vector_store %arg7[%c16, %c0_17], %49 {strides = array<i32>} : memref<288x256xf32, #tpu.memory_space<vmem>>, vector<8x256xf32>,
    %c1_i32_18 = arith.constant 1 : i32
    %51 = tpu.dynamic_rotate %32 by %c1_i32_18 dim 1 : vector<8x256xf32>, i32 -> vector<8x256xf32>
    %cst_19 = arith.constant 0.000000e+00 : f32
    %52 = vector.shape_cast %16 : vector<1x256xi1> to vector<1x256xi1>
    %53 = vector.broadcast %52 : vector<1x256xi1> to vector<8x256xi1>
    %54 = vector.broadcast %cst_19 : f32 to vector<8x256xf32>
    %55 = arith.select %53, %51, %54 : vector<8x256xi1>, vector<8x256xf32>
    %c24 = arith.constant 24 : index
    %c0_20 = arith.constant 0 : index
    %56 = vector.load %arg7[%c24, %c0_20] : memref<288x256xf32, #tpu.memory_space<vmem>>, vector<8x256xf32>
    tpu.vector_store %arg7[%c24, %c0_20], %55 {strides = array<i32>} : memref<288x256xf32, #tpu.memory_space<vmem>>, vector<8x256xf32>,
    %c32 = arith.constant 32 : index
    %c0_21 = arith.constant 0 : index
    %57 = vector.load %arg7[%c32, %c0_21] : memref<288x256xf32, #tpu.memory_space<vmem>>, vector<8x256xf32>
    tpu.vector_store %arg7[%c32, %c0_21], %32 {strides = array<i32>} : memref<288x256xf32, #tpu.memory_space<vmem>>, vector<8x256xf32>,
    %c255_i32 = arith.constant 255 : i32
    %58 = tpu.dynamic_rotate %32 by %c255_i32 dim 1 : vector<8x256xf32>, i32 -> vector<8x256xf32>
    %cst_22 = arith.constant 0.000000e+00 : f32
    %59 = vector.shape_cast %18 : vector<1x256xi1> to vector<1x256xi1>
    %60 = vector.broadcast %59 : vector<1x256xi1> to vector<8x256xi1>
    %61 = vector.broadcast %cst_22 : f32 to vector<8x256xf32>
    %62 = arith.select %60, %58, %61 : vector<8x256xi1>, vector<8x256xf32>
    %c40 = arith.constant 40 : index
    %c0_23 = arith.constant 0 : index
    %63 = vector.load %arg7[%c40, %c0_23] : memref<288x256xf32, #tpu.memory_space<vmem>>, vector<8x256xf32>
    tpu.vector_store %arg7[%c40, %c0_23], %62 {strides = array<i32>} : memref<288x256xf32, #tpu.memory_space<vmem>>, vector<8x256xf32>,
    %c241_i32 = arith.constant 241 : i32
    %64 = tpu.dynamic_rotate %32 by %c241_i32 dim 1 : vector<8x256xf32>, i32 -> vector<8x256xf32>
    %cst_24 = arith.constant 0.000000e+00 : f32
    %65 = vector.shape_cast %23 : vector<1x256xi1> to vector<1x256xi1>
    %66 = vector.broadcast %65 : vector<1x256xi1> to vector<8x256xi1>
    %67 = vector.broadcast %cst_24 : f32 to vector<8x256xf32>
    %68 = arith.select %66, %64, %67 : vector<8x256xi1>, vector<8x256xf32>
    %c48 = arith.constant 48 : index
    %c0_25 = arith.constant 0 : index
    %69 = vector.load %arg7[%c48, %c0_25] : memref<288x256xf32, #tpu.memory_space<vmem>>, vector<8x256xf32>
    tpu.vector_store %arg7[%c48, %c0_25], %68 {strides = array<i32>} : memref<288x256xf32, #tpu.memory_space<vmem>>, vector<8x256xf32>,
    %c240_i32_26 = arith.constant 240 : i32
    %70 = tpu.dynamic_rotate %32 by %c240_i32_26 dim 1 : vector<8x256xf32>, i32 -> vector<8x256xf32>
    %cst_27 = arith.constant 0.000000e+00 : f32
    %71 = vector.shape_cast %25 : vector<1x256xi1> to vector<1x256xi1>
    %72 = vector.broadcast %71 : vector<1x256xi1> to vector<8x256xi1>
    %73 = vector.broadcast %cst_27 : f32 to vector<8x256xf32>
    %74 = arith.select %72, %70, %73 : vector<8x256xi1>, vector<8x256xf32>
    %c56 = arith.constant 56 : index
    %c0_28 = arith.constant 0 : index
    %75 = vector.load %arg7[%c56, %c0_28] : memref<288x256xf32, #tpu.memory_space<vmem>>, vector<8x256xf32>
    tpu.vector_store %arg7[%c56, %c0_28], %74 {strides = array<i32>} : memref<288x256xf32, #tpu.memory_space<vmem>>, vector<8x256xf32>,
    %c239_i32 = arith.constant 239 : i32
    %76 = tpu.dynamic_rotate %32 by %c239_i32 dim 1 : vector<8x256xf32>, i32 -> vector<8x256xf32>
    %cst_29 = arith.constant 0.000000e+00 : f32
    %77 = vector.shape_cast %30 : vector<1x256xi1> to vector<1x256xi1>
    %78 = vector.broadcast %77 : vector<1x256xi1> to vector<8x256xi1>
    %79 = vector.broadcast %cst_29 : f32 to vector<8x256xf32>
    %80 = arith.select %78, %76, %79 : vector<8x256xi1>, vector<8x256xf32>
    %c64 = arith.constant 64 : index
    %c0_30 = arith.constant 0 : index
    %81 = vector.load %arg7[%c64, %c0_30] : memref<288x256xf32, #tpu.memory_space<vmem>>, vector<8x256xf32>
    tpu.vector_store %arg7[%c64, %c0_30], %80 {strides = array<i32>} : memref<288x256xf32, #tpu.memory_space<vmem>>, vector<8x256xf32>,
    %c0_31 = arith.constant 0 : index
    %c0_32 = arith.constant 0 : index
    %82 = vector.load %arg2[%c0_31, %c0_32] : memref<8x72xf32, #tpu.memory_space<vmem>>, vector<8x72xf32>
    %c0_33 = arith.constant 0 : index
    %c0_34 = arith.constant 0 : index
    %83 = vector.load %arg7[%c0_33, %c0_34] : memref<288x256xf32, #tpu.memory_space<vmem>>, vector<72x256xf32>
    %cst_35 = arith.constant dense<0.000000e+00> : vector<8x256xf32>
    %84 = tpu.matmul %82, %83, %cst_35 {dimension_numbers = #tpu.dot_dimension_numbers<[1], [0], [0], [1], [0, 0, 1, 1], [], []>} : vector<8x72xf32>, vector<72x256xf32>, vector<8x256xf32> -> vector<8x256xf32>
    %cst_36 = arith.constant 0.000000e+00 : f32
    %85 = vector.broadcast %cst_36 : f32 to vector<8x256xf32>
    %86 = arith.maximumf %84, %85 : vector<8x256xf32>
    %c17_i32_37 = arith.constant 17 : i32
    %87 = tpu.dynamic_rotate %86 by %c17_i32_37 dim 1 : vector<8x256xf32>, i32 -> vector<8x256xf32>
    %cst_38 = arith.constant 0.000000e+00 : f32
    %88 = vector.shape_cast %7 : vector<1x256xi1> to vector<1x256xi1>
    %89 = vector.broadcast %88 : vector<1x256xi1> to vector<8x256xi1>
    %90 = vector.broadcast %cst_38 : f32 to vector<8x256xf32>
    %91 = arith.select %89, %87, %90 : vector<8x256xi1>, vector<8x256xf32>
    %c72 = arith.constant 72 : index
    %c0_39 = arith.constant 0 : index
    %92 = vector.load %arg7[%c72, %c0_39] : memref<288x256xf32, #tpu.memory_space<vmem>>, vector<8x256xf32>
    tpu.vector_store %arg7[%c72, %c0_39], %91 {strides = array<i32>} : memref<288x256xf32, #tpu.memory_space<vmem>>, vector<8x256xf32>,
    %c16_i32_40 = arith.constant 16 : i32
    %93 = tpu.dynamic_rotate %86 by %c16_i32_40 dim 1 : vector<8x256xf32>, i32 -> vector<8x256xf32>
    %cst_41 = arith.constant 0.000000e+00 : f32
    %94 = vector.shape_cast %9 : vector<1x256xi1> to vector<1x256xi1>
    %95 = vector.broadcast %94 : vector<1x256xi1> to vector<8x256xi1>
    %96 = vector.broadcast %cst_41 : f32 to vector<8x256xf32>
    %97 = arith.select %95, %93, %96 : vector<8x256xi1>, vector<8x256xf32>
    %c80 = arith.constant 80 : index
    %c0_42 = arith.constant 0 : index
    %98 = vector.load %arg7[%c80, %c0_42] : memref<288x256xf32, #tpu.memory_space<vmem>>, vector<8x256xf32>
    tpu.vector_store %arg7[%c80, %c0_42], %97 {strides = array<i32>} : memref<288x256xf32, #tpu.memory_space<vmem>>, vector<8x256xf32>,
    %c15_i32_43 = arith.constant 15 : i32
    %99 = tpu.dynamic_rotate %86 by %c15_i32_43 dim 1 : vector<8x256xf32>, i32 -> vector<8x256xf32>
    %cst_44 = arith.constant 0.000000e+00 : f32
    %100 = vector.shape_cast %14 : vector<1x256xi1> to vector<1x256xi1>
    %101 = vector.broadcast %100 : vector<1x256xi1> to vector<8x256xi1>
    %102 = vector.broadcast %cst_44 : f32 to vector<8x256xf32>
    %103 = arith.select %101, %99, %102 : vector<8x256xi1>, vector<8x256xf32>
    %c88 = arith.constant 88 : index
    %c0_45 = arith.constant 0 : index
    %104 = vector.load %arg7[%c88, %c0_45] : memref<288x256xf32, #tpu.memory_space<vmem>>, vector<8x256xf32>
    tpu.vector_store %arg7[%c88, %c0_45], %103 {strides = array<i32>} : memref<288x256xf32, #tpu.memory_space<vmem>>, vector<8x256xf32>,
    %c1_i32_46 = arith.constant 1 : i32
    %105 = tpu.dynamic_rotate %86 by %c1_i32_46 dim 1 : vector<8x256xf32>, i32 -> vector<8x256xf32>
    %cst_47 = arith.constant 0.000000e+00 : f32
    %106 = vector.shape_cast %16 : vector<1x256xi1> to vector<1x256xi1>
    %107 = vector.broadcast %106 : vector<1x256xi1> to vector<8x256xi1>
    %108 = vector.broadcast %cst_47 : f32 to vector<8x256xf32>
    %109 = arith.select %107, %105, %108 : vector<8x256xi1>, vector<8x256xf32>
    %c96 = arith.constant 96 : index
    %c0_48 = arith.constant 0 : index
    %110 = vector.load %arg7[%c96, %c0_48] : memref<288x256xf32, #tpu.memory_space<vmem>>, vector<8x256xf32>
    tpu.vector_store %arg7[%c96, %c0_48], %109 {strides = array<i32>} : memref<288x256xf32, #tpu.memory_space<vmem>>, vector<8x256xf32>,
    %c104 = arith.constant 104 : index
    %c0_49 = arith.constant 0 : index
    %111 = vector.load %arg7[%c104, %c0_49] : memref<288x256xf32, #tpu.memory_space<vmem>>, vector<8x256xf32>
    tpu.vector_store %arg7[%c104, %c0_49], %86 {strides = array<i32>} : memref<288x256xf32, #tpu.memory_space<vmem>>, vector<8x256xf32>,
    %c255_i32_50 = arith.constant 255 : i32
    %112 = tpu.dynamic_rotate %86 by %c255_i32_50 dim 1 : vector<8x256xf32>, i32 -> vector<8x256xf32>
    %cst_51 = arith.constant 0.000000e+00 : f32
    %113 = vector.shape_cast %18 : vector<1x256xi1> to vector<1x256xi1>
    %114 = vector.broadcast %113 : vector<1x256xi1> to vector<8x256xi1>
    %115 = vector.broadcast %cst_51 : f32 to vector<8x256xf32>
    %116 = arith.select %114, %112, %115 : vector<8x256xi1>, vector<8x256xf32>
    %c112 = arith.constant 112 : index
    %c0_52 = arith.constant 0 : index
    %117 = vector.load %arg7[%c112, %c0_52] : memref<288x256xf32, #tpu.memory_space<vmem>>, vector<8x256xf32>
    tpu.vector_store %arg7[%c112, %c0_52], %116 {strides = array<i32>} : memref<288x256xf32, #tpu.memory_space<vmem>>, vector<8x256xf32>,
    %c241_i32_53 = arith.constant 241 : i32
    %118 = tpu.dynamic_rotate %86 by %c241_i32_53 dim 1 : vector<8x256xf32>, i32 -> vector<8x256xf32>
    %cst_54 = arith.constant 0.000000e+00 : f32
    %119 = vector.shape_cast %23 : vector<1x256xi1> to vector<1x256xi1>
    %120 = vector.broadcast %119 : vector<1x256xi1> to vector<8x256xi1>
    %121 = vector.broadcast %cst_54 : f32 to vector<8x256xf32>
    %122 = arith.select %120, %118, %121 : vector<8x256xi1>, vector<8x256xf32>
    %c120 = arith.constant 120 : index
    %c0_55 = arith.constant 0 : index
    %123 = vector.load %arg7[%c120, %c0_55] : memref<288x256xf32, #tpu.memory_space<vmem>>, vector<8x256xf32>
    tpu.vector_store %arg7[%c120, %c0_55], %122 {strides = array<i32>} : memref<288x256xf32, #tpu.memory_space<vmem>>, vector<8x256xf32>,
    %c240_i32_56 = arith.constant 240 : i32
    %124 = tpu.dynamic_rotate %86 by %c240_i32_56 dim 1 : vector<8x256xf32>, i32 -> vector<8x256xf32>
    %cst_57 = arith.constant 0.000000e+00 : f32
    %125 = vector.shape_cast %25 : vector<1x256xi1> to vector<1x256xi1>
    %126 = vector.broadcast %125 : vector<1x256xi1> to vector<8x256xi1>
    %127 = vector.broadcast %cst_57 : f32 to vector<8x256xf32>
    %128 = arith.select %126, %124, %127 : vector<8x256xi1>, vector<8x256xf32>
    %c128 = arith.constant 128 : index
    %c0_58 = arith.constant 0 : index
    %129 = vector.load %arg7[%c128, %c0_58] : memref<288x256xf32, #tpu.memory_space<vmem>>, vector<8x256xf32>
    tpu.vector_store %arg7[%c128, %c0_58], %128 {strides = array<i32>} : memref<288x256xf32, #tpu.memory_space<vmem>>, vector<8x256xf32>,
    %c239_i32_59 = arith.constant 239 : i32
    %130 = tpu.dynamic_rotate %86 by %c239_i32_59 dim 1 : vector<8x256xf32>, i32 -> vector<8x256xf32>
    %cst_60 = arith.constant 0.000000e+00 : f32
    %131 = vector.shape_cast %30 : vector<1x256xi1> to vector<1x256xi1>
    %132 = vector.broadcast %131 : vector<1x256xi1> to vector<8x256xi1>
    %133 = vector.broadcast %cst_60 : f32 to vector<8x256xf32>
    %134 = arith.select %132, %130, %133 : vector<8x256xi1>, vector<8x256xf32>
    %c136 = arith.constant 136 : index
    %c0_61 = arith.constant 0 : index
    %135 = vector.load %arg7[%c136, %c0_61] : memref<288x256xf32, #tpu.memory_space<vmem>>, vector<8x256xf32>
    tpu.vector_store %arg7[%c136, %c0_61], %134 {strides = array<i32>} : memref<288x256xf32, #tpu.memory_space<vmem>>, vector<8x256xf32>,
    %c0_62 = arith.constant 0 : index
    %c0_63 = arith.constant 0 : index
    %136 = vector.load %arg3[%c0_62, %c0_63] : memref<8x144xf32, #tpu.memory_space<vmem>>, vector<8x144xf32>
    %c0_64 = arith.constant 0 : index
    %c0_65 = arith.constant 0 : index
    %137 = vector.load %arg7[%c0_64, %c0_65] : memref<288x256xf32, #tpu.memory_space<vmem>>, vector<144x256xf32>
    %cst_66 = arith.constant dense<0.000000e+00> : vector<8x256xf32>
    %138 = tpu.matmul %136, %137, %cst_66 {dimension_numbers = #tpu.dot_dimension_numbers<[1], [0], [0], [1], [0, 0, 1, 1], [], []>} : vector<8x144xf32>, vector<144x256xf32>, vector<8x256xf32> -> vector<8x256xf32>
    %cst_67 = arith.constant 0.000000e+00 : f32
    %139 = vector.broadcast %cst_67 : f32 to vector<8x256xf32>
    %140 = arith.maximumf %138, %139 : vector<8x256xf32>
    %c17_i32_68 = arith.constant 17 : i32
    %141 = tpu.dynamic_rotate %140 by %c17_i32_68 dim 1 : vector<8x256xf32>, i32 -> vector<8x256xf32>
    %cst_69 = arith.constant 0.000000e+00 : f32
    %142 = vector.shape_cast %7 : vector<1x256xi1> to vector<1x256xi1>
    %143 = vector.broadcast %142 : vector<1x256xi1> to vector<8x256xi1>
    %144 = vector.broadcast %cst_69 : f32 to vector<8x256xf32>
    %145 = arith.select %143, %141, %144 : vector<8x256xi1>, vector<8x256xf32>
    %c144 = arith.constant 144 : index
    %c0_70 = arith.constant 0 : index
    %146 = vector.load %arg7[%c144, %c0_70] : memref<288x256xf32, #tpu.memory_space<vmem>>, vector<8x256xf32>
    tpu.vector_store %arg7[%c144, %c0_70], %145 {strides = array<i32>} : memref<288x256xf32, #tpu.memory_space<vmem>>, vector<8x256xf32>,
    %c16_i32_71 = arith.constant 16 : i32
    %147 = tpu.dynamic_rotate %140 by %c16_i32_71 dim 1 : vector<8x256xf32>, i32 -> vector<8x256xf32>
    %cst_72 = arith.constant 0.000000e+00 : f32
    %148 = vector.shape_cast %9 : vector<1x256xi1> to vector<1x256xi1>
    %149 = vector.broadcast %148 : vector<1x256xi1> to vector<8x256xi1>
    %150 = vector.broadcast %cst_72 : f32 to vector<8x256xf32>
    %151 = arith.select %149, %147, %150 : vector<8x256xi1>, vector<8x256xf32>
    %c152 = arith.constant 152 : index
    %c0_73 = arith.constant 0 : index
    %152 = vector.load %arg7[%c152, %c0_73] : memref<288x256xf32, #tpu.memory_space<vmem>>, vector<8x256xf32>
    tpu.vector_store %arg7[%c152, %c0_73], %151 {strides = array<i32>} : memref<288x256xf32, #tpu.memory_space<vmem>>, vector<8x256xf32>,
    %c15_i32_74 = arith.constant 15 : i32
    %153 = tpu.dynamic_rotate %140 by %c15_i32_74 dim 1 : vector<8x256xf32>, i32 -> vector<8x256xf32>
    %cst_75 = arith.constant 0.000000e+00 : f32
    %154 = vector.shape_cast %14 : vector<1x256xi1> to vector<1x256xi1>
    %155 = vector.broadcast %154 : vector<1x256xi1> to vector<8x256xi1>
    %156 = vector.broadcast %cst_75 : f32 to vector<8x256xf32>
    %157 = arith.select %155, %153, %156 : vector<8x256xi1>, vector<8x256xf32>
    %c160 = arith.constant 160 : index
    %c0_76 = arith.constant 0 : index
    %158 = vector.load %arg7[%c160, %c0_76] : memref<288x256xf32, #tpu.memory_space<vmem>>, vector<8x256xf32>
    tpu.vector_store %arg7[%c160, %c0_76], %157 {strides = array<i32>} : memref<288x256xf32, #tpu.memory_space<vmem>>, vector<8x256xf32>,
    %c1_i32_77 = arith.constant 1 : i32
    %159 = tpu.dynamic_rotate %140 by %c1_i32_77 dim 1 : vector<8x256xf32>, i32 -> vector<8x256xf32>
    %cst_78 = arith.constant 0.000000e+00 : f32
    %160 = vector.shape_cast %16 : vector<1x256xi1> to vector<1x256xi1>
    %161 = vector.broadcast %160 : vector<1x256xi1> to vector<8x256xi1>
    %162 = vector.broadcast %cst_78 : f32 to vector<8x256xf32>
    %163 = arith.select %161, %159, %162 : vector<8x256xi1>, vector<8x256xf32>
    %c168 = arith.constant 168 : index
    %c0_79 = arith.constant 0 : index
    %164 = vector.load %arg7[%c168, %c0_79] : memref<288x256xf32, #tpu.memory_space<vmem>>, vector<8x256xf32>
    tpu.vector_store %arg7[%c168, %c0_79], %163 {strides = array<i32>} : memref<288x256xf32, #tpu.memory_space<vmem>>, vector<8x256xf32>,
    %c176 = arith.constant 176 : index
    %c0_80 = arith.constant 0 : index
    %165 = vector.load %arg7[%c176, %c0_80] : memref<288x256xf32, #tpu.memory_space<vmem>>, vector<8x256xf32>
    tpu.vector_store %arg7[%c176, %c0_80], %140 {strides = array<i32>} : memref<288x256xf32, #tpu.memory_space<vmem>>, vector<8x256xf32>,
    %c255_i32_81 = arith.constant 255 : i32
    %166 = tpu.dynamic_rotate %140 by %c255_i32_81 dim 1 : vector<8x256xf32>, i32 -> vector<8x256xf32>
    %cst_82 = arith.constant 0.000000e+00 : f32
    %167 = vector.shape_cast %18 : vector<1x256xi1> to vector<1x256xi1>
    %168 = vector.broadcast %167 : vector<1x256xi1> to vector<8x256xi1>
    %169 = vector.broadcast %cst_82 : f32 to vector<8x256xf32>
    %170 = arith.select %168, %166, %169 : vector<8x256xi1>, vector<8x256xf32>
    %c184 = arith.constant 184 : index
    %c0_83 = arith.constant 0 : index
    %171 = vector.load %arg7[%c184, %c0_83] : memref<288x256xf32, #tpu.memory_space<vmem>>, vector<8x256xf32>
    tpu.vector_store %arg7[%c184, %c0_83], %170 {strides = array<i32>} : memref<288x256xf32, #tpu.memory_space<vmem>>, vector<8x256xf32>,
    %c241_i32_84 = arith.constant 241 : i32
    %172 = tpu.dynamic_rotate %140 by %c241_i32_84 dim 1 : vector<8x256xf32>, i32 -> vector<8x256xf32>
    %cst_85 = arith.constant 0.000000e+00 : f32
    %173 = vector.shape_cast %23 : vector<1x256xi1> to vector<1x256xi1>
    %174 = vector.broadcast %173 : vector<1x256xi1> to vector<8x256xi1>
    %175 = vector.broadcast %cst_85 : f32 to vector<8x256xf32>
    %176 = arith.select %174, %172, %175 : vector<8x256xi1>, vector<8x256xf32>
    %c192 = arith.constant 192 : index
    %c0_86 = arith.constant 0 : index
    %177 = vector.load %arg7[%c192, %c0_86] : memref<288x256xf32, #tpu.memory_space<vmem>>, vector<8x256xf32>
    tpu.vector_store %arg7[%c192, %c0_86], %176 {strides = array<i32>} : memref<288x256xf32, #tpu.memory_space<vmem>>, vector<8x256xf32>,
    %c240_i32_87 = arith.constant 240 : i32
    %178 = tpu.dynamic_rotate %140 by %c240_i32_87 dim 1 : vector<8x256xf32>, i32 -> vector<8x256xf32>
    %cst_88 = arith.constant 0.000000e+00 : f32
    %179 = vector.shape_cast %25 : vector<1x256xi1> to vector<1x256xi1>
    %180 = vector.broadcast %179 : vector<1x256xi1> to vector<8x256xi1>
    %181 = vector.broadcast %cst_88 : f32 to vector<8x256xf32>
    %182 = arith.select %180, %178, %181 : vector<8x256xi1>, vector<8x256xf32>
    %c200 = arith.constant 200 : index
    %c0_89 = arith.constant 0 : index
    %183 = vector.load %arg7[%c200, %c0_89] : memref<288x256xf32, #tpu.memory_space<vmem>>, vector<8x256xf32>
    tpu.vector_store %arg7[%c200, %c0_89], %182 {strides = array<i32>} : memref<288x256xf32, #tpu.memory_space<vmem>>, vector<8x256xf32>,
    %c239_i32_90 = arith.constant 239 : i32
    %184 = tpu.dynamic_rotate %140 by %c239_i32_90 dim 1 : vector<8x256xf32>, i32 -> vector<8x256xf32>
    %cst_91 = arith.constant 0.000000e+00 : f32
    %185 = vector.shape_cast %30 : vector<1x256xi1> to vector<1x256xi1>
    %186 = vector.broadcast %185 : vector<1x256xi1> to vector<8x256xi1>
    %187 = vector.broadcast %cst_91 : f32 to vector<8x256xf32>
    %188 = arith.select %186, %184, %187 : vector<8x256xi1>, vector<8x256xf32>
    %c208 = arith.constant 208 : index
    %c0_92 = arith.constant 0 : index
    %189 = vector.load %arg7[%c208, %c0_92] : memref<288x256xf32, #tpu.memory_space<vmem>>, vector<8x256xf32>
    tpu.vector_store %arg7[%c208, %c0_92], %188 {strides = array<i32>} : memref<288x256xf32, #tpu.memory_space<vmem>>, vector<8x256xf32>,
    %c0_93 = arith.constant 0 : index
    %c0_94 = arith.constant 0 : index
    %190 = vector.load %arg4[%c0_93, %c0_94] : memref<8x216xf32, #tpu.memory_space<vmem>>, vector<8x216xf32>
    %c0_95 = arith.constant 0 : index
    %c0_96 = arith.constant 0 : index
    %191 = vector.load %arg7[%c0_95, %c0_96] : memref<288x256xf32, #tpu.memory_space<vmem>>, vector<216x256xf32>
    %cst_97 = arith.constant dense<0.000000e+00> : vector<8x256xf32>
    %192 = tpu.matmul %190, %191, %cst_97 {dimension_numbers = #tpu.dot_dimension_numbers<[1], [0], [0], [1], [0, 0, 1, 1], [], []>} : vector<8x216xf32>, vector<216x256xf32>, vector<8x256xf32> -> vector<8x256xf32>
    %cst_98 = arith.constant 0.000000e+00 : f32
    %193 = vector.broadcast %cst_98 : f32 to vector<8x256xf32>
    %194 = arith.maximumf %192, %193 : vector<8x256xf32>
    %c17_i32_99 = arith.constant 17 : i32
    %195 = tpu.dynamic_rotate %194 by %c17_i32_99 dim 1 : vector<8x256xf32>, i32 -> vector<8x256xf32>
    %cst_100 = arith.constant 0.000000e+00 : f32
    %196 = vector.shape_cast %7 : vector<1x256xi1> to vector<1x256xi1>
    %197 = vector.broadcast %196 : vector<1x256xi1> to vector<8x256xi1>
    %198 = vector.broadcast %cst_100 : f32 to vector<8x256xf32>
    %199 = arith.select %197, %195, %198 : vector<8x256xi1>, vector<8x256xf32>
    %c216 = arith.constant 216 : index
    %c0_101 = arith.constant 0 : index
    %200 = vector.load %arg7[%c216, %c0_101] : memref<288x256xf32, #tpu.memory_space<vmem>>, vector<8x256xf32>
    tpu.vector_store %arg7[%c216, %c0_101], %199 {strides = array<i32>} : memref<288x256xf32, #tpu.memory_space<vmem>>, vector<8x256xf32>,
    %c16_i32_102 = arith.constant 16 : i32
    %201 = tpu.dynamic_rotate %194 by %c16_i32_102 dim 1 : vector<8x256xf32>, i32 -> vector<8x256xf32>
    %cst_103 = arith.constant 0.000000e+00 : f32
    %202 = vector.shape_cast %9 : vector<1x256xi1> to vector<1x256xi1>
    %203 = vector.broadcast %202 : vector<1x256xi1> to vector<8x256xi1>
    %204 = vector.broadcast %cst_103 : f32 to vector<8x256xf32>
    %205 = arith.select %203, %201, %204 : vector<8x256xi1>, vector<8x256xf32>
    %c224 = arith.constant 224 : index
    %c0_104 = arith.constant 0 : index
    %206 = vector.load %arg7[%c224, %c0_104] : memref<288x256xf32, #tpu.memory_space<vmem>>, vector<8x256xf32>
    tpu.vector_store %arg7[%c224, %c0_104], %205 {strides = array<i32>} : memref<288x256xf32, #tpu.memory_space<vmem>>, vector<8x256xf32>,
    %c15_i32_105 = arith.constant 15 : i32
    %207 = tpu.dynamic_rotate %194 by %c15_i32_105 dim 1 : vector<8x256xf32>, i32 -> vector<8x256xf32>
    %cst_106 = arith.constant 0.000000e+00 : f32
    %208 = vector.shape_cast %14 : vector<1x256xi1> to vector<1x256xi1>
    %209 = vector.broadcast %208 : vector<1x256xi1> to vector<8x256xi1>
    %210 = vector.broadcast %cst_106 : f32 to vector<8x256xf32>
    %211 = arith.select %209, %207, %210 : vector<8x256xi1>, vector<8x256xf32>
    %c232 = arith.constant 232 : index
    %c0_107 = arith.constant 0 : index
    %212 = vector.load %arg7[%c232, %c0_107] : memref<288x256xf32, #tpu.memory_space<vmem>>, vector<8x256xf32>
    tpu.vector_store %arg7[%c232, %c0_107], %211 {strides = array<i32>} : memref<288x256xf32, #tpu.memory_space<vmem>>, vector<8x256xf32>,
    %c1_i32_108 = arith.constant 1 : i32
    %213 = tpu.dynamic_rotate %194 by %c1_i32_108 dim 1 : vector<8x256xf32>, i32 -> vector<8x256xf32>
    %cst_109 = arith.constant 0.000000e+00 : f32
    %214 = vector.shape_cast %16 : vector<1x256xi1> to vector<1x256xi1>
    %215 = vector.broadcast %214 : vector<1x256xi1> to vector<8x256xi1>
    %216 = vector.broadcast %cst_109 : f32 to vector<8x256xf32>
    %217 = arith.select %215, %213, %216 : vector<8x256xi1>, vector<8x256xf32>
    %c240 = arith.constant 240 : index
    %c0_110 = arith.constant 0 : index
    %218 = vector.load %arg7[%c240, %c0_110] : memref<288x256xf32, #tpu.memory_space<vmem>>, vector<8x256xf32>
    tpu.vector_store %arg7[%c240, %c0_110], %217 {strides = array<i32>} : memref<288x256xf32, #tpu.memory_space<vmem>>, vector<8x256xf32>,
    %c248 = arith.constant 248 : index
    %c0_111 = arith.constant 0 : index
    %219 = vector.load %arg7[%c248, %c0_111] : memref<288x256xf32, #tpu.memory_space<vmem>>, vector<8x256xf32>
    tpu.vector_store %arg7[%c248, %c0_111], %194 {strides = array<i32>} : memref<288x256xf32, #tpu.memory_space<vmem>>, vector<8x256xf32>,
    %c255_i32_112 = arith.constant 255 : i32
    %220 = tpu.dynamic_rotate %194 by %c255_i32_112 dim 1 : vector<8x256xf32>, i32 -> vector<8x256xf32>
    %cst_113 = arith.constant 0.000000e+00 : f32
    %221 = vector.shape_cast %18 : vector<1x256xi1> to vector<1x256xi1>
    %222 = vector.broadcast %221 : vector<1x256xi1> to vector<8x256xi1>
    %223 = vector.broadcast %cst_113 : f32 to vector<8x256xf32>
    %224 = arith.select %222, %220, %223 : vector<8x256xi1>, vector<8x256xf32>
    %c256 = arith.constant 256 : index
    %c0_114 = arith.constant 0 : index
    %225 = vector.load %arg7[%c256, %c0_114] : memref<288x256xf32, #tpu.memory_space<vmem>>, vector<8x256xf32>
    tpu.vector_store %arg7[%c256, %c0_114], %224 {strides = array<i32>} : memref<288x256xf32, #tpu.memory_space<vmem>>, vector<8x256xf32>,
    %c241_i32_115 = arith.constant 241 : i32
    %226 = tpu.dynamic_rotate %194 by %c241_i32_115 dim 1 : vector<8x256xf32>, i32 -> vector<8x256xf32>
    %cst_116 = arith.constant 0.000000e+00 : f32
    %227 = vector.shape_cast %23 : vector<1x256xi1> to vector<1x256xi1>
    %228 = vector.broadcast %227 : vector<1x256xi1> to vector<8x256xi1>
    %229 = vector.broadcast %cst_116 : f32 to vector<8x256xf32>
    %230 = arith.select %228, %226, %229 : vector<8x256xi1>, vector<8x256xf32>
    %c264 = arith.constant 264 : index
    %c0_117 = arith.constant 0 : index
    %231 = vector.load %arg7[%c264, %c0_117] : memref<288x256xf32, #tpu.memory_space<vmem>>, vector<8x256xf32>
    tpu.vector_store %arg7[%c264, %c0_117], %230 {strides = array<i32>} : memref<288x256xf32, #tpu.memory_space<vmem>>, vector<8x256xf32>,
    %c240_i32_118 = arith.constant 240 : i32
    %232 = tpu.dynamic_rotate %194 by %c240_i32_118 dim 1 : vector<8x256xf32>, i32 -> vector<8x256xf32>
    %cst_119 = arith.constant 0.000000e+00 : f32
    %233 = vector.shape_cast %25 : vector<1x256xi1> to vector<1x256xi1>
    %234 = vector.broadcast %233 : vector<1x256xi1> to vector<8x256xi1>
    %235 = vector.broadcast %cst_119 : f32 to vector<8x256xf32>
    %236 = arith.select %234, %232, %235 : vector<8x256xi1>, vector<8x256xf32>
    %c272 = arith.constant 272 : index
    %c0_120 = arith.constant 0 : index
    %237 = vector.load %arg7[%c272, %c0_120] : memref<288x256xf32, #tpu.memory_space<vmem>>, vector<8x256xf32>
    tpu.vector_store %arg7[%c272, %c0_120], %236 {strides = array<i32>} : memref<288x256xf32, #tpu.memory_space<vmem>>, vector<8x256xf32>,
    %c239_i32_121 = arith.constant 239 : i32
    %238 = tpu.dynamic_rotate %194 by %c239_i32_121 dim 1 : vector<8x256xf32>, i32 -> vector<8x256xf32>
    %cst_122 = arith.constant 0.000000e+00 : f32
    %239 = vector.shape_cast %30 : vector<1x256xi1> to vector<1x256xi1>
    %240 = vector.broadcast %239 : vector<1x256xi1> to vector<8x256xi1>
    %241 = vector.broadcast %cst_122 : f32 to vector<8x256xf32>
    %242 = arith.select %240, %238, %241 : vector<8x256xi1>, vector<8x256xf32>
    %c280 = arith.constant 280 : index
    %c0_123 = arith.constant 0 : index
    %243 = vector.load %arg7[%c280, %c0_123] : memref<288x256xf32, #tpu.memory_space<vmem>>, vector<8x256xf32>
    tpu.vector_store %arg7[%c280, %c0_123], %242 {strides = array<i32>} : memref<288x256xf32, #tpu.memory_space<vmem>>, vector<8x256xf32>,
    %c32_124 = arith.constant 32 : index
    %c0_125 = arith.constant 0 : index
    %244 = vector.load %arg7[%c32_124, %c0_125] : memref<288x256xf32, #tpu.memory_space<vmem>>, vector<8x256xf32>
    %c104_126 = arith.constant 104 : index
    %c0_127 = arith.constant 0 : index
    %245 = vector.load %arg7[%c104_126, %c0_127] : memref<288x256xf32, #tpu.memory_space<vmem>>, vector<8x256xf32>
    %c176_128 = arith.constant 176 : index
    %c0_129 = arith.constant 0 : index
    %246 = vector.load %arg7[%c176_128, %c0_129] : memref<288x256xf32, #tpu.memory_space<vmem>>, vector<8x256xf32>
    %c248_130 = arith.constant 248 : index
    %c0_131 = arith.constant 0 : index
    %247 = vector.load %arg7[%c248_130, %c0_131] : memref<288x256xf32, #tpu.memory_space<vmem>>, vector<8x256xf32>
    %248 = tpu.concatenate %244, %245, %246, %247 in 0 : vector<8x256xf32>, vector<8x256xf32>, vector<8x256xf32>, vector<8x256xf32> -> vector<32x256xf32>
    %c0_132 = arith.constant 0 : index
    %c0_133 = arith.constant 0 : index
    %249 = vector.load %arg5[%c0_132, %c0_133] : memref<8x32xf32, #tpu.memory_space<vmem>>, vector<8x32xf32>
    %cst_134 = arith.constant dense<0.000000e+00> : vector<8x256xf32>
    %250 = tpu.matmul %249, %248, %cst_134 {dimension_numbers = #tpu.dot_dimension_numbers<[1], [0], [0], [1], [0, 0, 1, 1], [], []>} : vector<8x32xf32>, vector<32x256xf32>, vector<8x256xf32> -> vector<8x256xf32>
    %251 = arith.addf %250, %32 : vector<8x256xf32>
    %c0_135 = arith.constant 0 : index
    %c0_136 = arith.constant 0 : index
    %c0_137 = arith.constant 0 : index
    %252 = vector.load %arg6[%c0_135, %c0_136, %c0_137] : memref<1x8x256xf32, #tpu.memory_space<vmem>>, vector<1x8x256xf32>
    %253 = vector.shape_cast %252 : vector<1x8x256xf32> to vector<8x256xf32>
    %254 = vector.shape_cast %251 : vector<8x256xf32> to vector<1x8x256xf32>
    tpu.vector_store %arg6[%c0_135, %c0_136, %c0_137], %254 {strides = array<i32>} : memref<1x8x256xf32, #tpu.memory_space<vmem>>, vector<1x8x256xf32>,
    return
  }
  func.func @transform_0(%arg0: i32) -> (i32, i32, i32) {
    %c0_i32 = arith.constant 0 : i32
    %c0_i32_0 = arith.constant 0 : i32
    %c0_i32_1 = arith.constant 0 : i32
    return %arg0, %c0_i32, %c0_i32_0 : i32, i32, i32
  }
  func.func @transform_1(%arg0: i32) -> (i32, i32) {
    %c0_i32 = arith.constant 0 : i32
    %c0_i32_0 = arith.constant 0 : i32
    %c0_i32_1 = arith.constant 0 : i32
    return %c0_i32, %c0_i32_0 : i32, i32
  }
  func.func @transform_2(%arg0: i32) -> (i32, i32) {
    %c0_i32 = arith.constant 0 : i32
    %c0_i32_0 = arith.constant 0 : i32
    %c0_i32_1 = arith.constant 0 : i32
    return %c0_i32, %c0_i32_0 : i32, i32
  }
  func.func @transform_3(%arg0: i32) -> (i32, i32) {
    %c0_i32 = arith.constant 0 : i32
    %c0_i32_0 = arith.constant 0 : i32
    %c0_i32_1 = arith.constant 0 : i32
    return %c0_i32, %c0_i32_0 : i32, i32
  }
  func.func @transform_4(%arg0: i32) -> (i32, i32) {
    %c0_i32 = arith.constant 0 : i32
    %c0_i32_0 = arith.constant 0 : i32
    %c0_i32_1 = arith.constant 0 : i32
    return %c0_i32, %c0_i32_0 : i32, i32
  }
  func.func @transform_5(%arg0: i32) -> (i32, i32, i32) {
    %c0_i32 = arith.constant 0 : i32
    %c0_i32_0 = arith.constant 0 : i32
    %c0_i32_1 = arith.constant 0 : i32
    return %arg0, %c0_i32, %c0_i32_0 : i32, i32, i32
  }
}

</mosaic_0001>

<bundles_post_ra>
// kernel: tpu_custom_call.1
= control target key start
LH: loop header
LB: loop body
LE: loop exit
PB: predicated region body
PF: predicated region fallthrough
CT: control target
= control target key end

     0   :  { %10 = vsyncpa [#allocation4], 0  ;;  %s2428_s0 = inlined_call_operand.hbm [shape: f32[2,8,256], index: 0, kind: input, shape index: {}]   ;;  %s2429_s1 = inlined_call_operand.hbm [shape: f32[8,72], index: 1, kind: input, shape index: {}]   ;;  %s2430_s2 = inlined_call_operand.hbm [shape: f32[8,144], index: 2, kind: input, shape index: {}]   ;;  %s2431_s3 = inlined_call_operand.hbm [shape: f32[8,216], index: 3, kind: input, shape index: {}]   ;;  %s2432_s4 = inlined_call_operand.hbm [shape: f32[8,32], index: 4, kind: input, shape index: {}]   ;;  %s2433_s5 = inlined_call_operand.hbm [shape: f32[2,8,256], index: 5, kind: output, shape index: {}]  }
   0x1   :  { %12 = vsyncpa [#allocation4 + $0x1], 0 }
   0x2   :  { %13 = vsyncpa [#allocation7], 0 }
   0x3   :  { %14 = vsyncpa [#allocation10], 0 }
   0x4   :  { %15 = vsyncpa [#allocation5], 0 }
   0x5   :  { %17 = vsyncpa [#allocation5 + $0x1], 0  ;;  %s1682_s18 = smov 0   ;;  %s1684_s19 = smov 0  }
   0x6   :  { %s1686_s20 = smov 0   ;;  %s1688_s21 = smov 0  }
   0x7 LB: > { %s176_s24 = sshll.u32 %s2429_s1, 4  ;;  %s1706_s25 = sadd.s32 4294967295, %s1638_s21   ;;  %s1638_s21 = sphi %s1688_s21, %s2489_s21   ;;  %s1634_s20 = sphi %s1686_s20, %s2488_s20   ;;  %s1630_s19 = sphi %s1684_s19, %s2487_s19   ;;  %s1626_s18 = sphi %s1682_s18, %s2486_s18   ;;  %s177_s24 = int_to_ptr.hbm [resolvable:$true] %s176_s24 }
   0x8   : > { %p1204_p0 = scmp.ge.s32.totalorder %s1638_s21, 1  ;;  %p44_p1 = scmp.eq.s32.totalorder %s1706_s25, 0 }
   0x9   : > { %p164_p2 = scmp.lt.s32.totalorder %s1638_s21, 3  ;;  %s1640_s27 = smov [#allocation6]  }
   0xa   : > { %s178_s28 = sshll.u32 %s1640_s27, 4  ;;  %s200_s6 = sshll.u32 %s2431_s3, 4  ;;  %s179_s28 = int_to_ptr.vmem [resolvable:$true] %s178_s28  ;;  %s201_s6 = int_to_ptr.hbm [resolvable:$true] %s200_s6 }
   0xb   : > { %p1711_p3 = pnand %p1204_p0, %p164_p2  ;;  %s1641_s8 = smov [#allocation9]  }
   0xc   : > { %s202_s9 = sshll.u32 %s1641_s8, 4  ;;  %s188_s12 = sshll.u32 %s2430_s2, 4  ;;  %s203_s9 = int_to_ptr.vmem [resolvable:$true] %s202_s9  ;;  %s189_s12 = int_to_ptr.hbm [resolvable:$true] %s188_s12 }
   0xd   : > { %p1339_p5 = pneg %p1711_p3  ;;  %s212_s15 = sshll.u32 %s2432_s4, 4  ;;  %s213_s15 = int_to_ptr.hbm [resolvable:$true] %s212_s15 }
   0xe   : > { %s1642_s16 = smov [#allocation8]   ;;  %s1643_s22 = smov [#allocation11]  }
   0xf   : > { %p1723_p6 = pnand %p1339_p5, %p44_p1  ;;  %s190_s17 = sshll.u32 %s1642_s16, 4  ;;  %s191_s17 = int_to_ptr.vmem [resolvable:$true] %s190_s17 }
  0x10   : > { %s214_s23 = sshll.u32 %s1643_s22, 4  ;;  %s1743_s27 = sadd.s32 1, %s1638_s21   ;;  %s215_s23 = int_to_ptr.vmem [resolvable:$true] %s214_s23 }
  0x11   : > { %1342 = dma.hbm_to_vmem [thread:$0]  (!%p1723_p6), %s177_s24, 128, %s179_s28, [#allocation7]  }
  0x12   : > { %1348 = dma.hbm_to_vmem [thread:$0]  (!%p1723_p6), %s201_s6, 256, %s203_s9, [#allocation10]  }
  0x13   : > { %1345 = dma.hbm_to_vmem [thread:$0]  (!%p1723_p6), %s189_s12, 256, %s191_s17, [#allocation7]  }
  0x14   : > { %1351 = dma.hbm_to_vmem [thread:$0]  (!%p1723_p6), %s213_s15, 128, %s215_s23, [#allocation10]  }
  0x15   : > { %s1203_s24 = sadd.s32 4294967294, %s1638_s21   ;;  %s27_s28 = ssub.s32 %s1638_s21, %s1743_s27 }
  0x16   : > { %s30_s29 = sadd.s32 1, %s1634_s20  ;;  %p28_p7 = scmp.eq.s32.totalorder %s27_s28, 0 }
  0x17   : > { %p37_p8 = scmp.ne.s32.totalorder %s1634_s20, %s1630_s19  ;;  %p38_p9 = scmp.eq.s32.totalorder %s1638_s21, 0 }
  0x18   : > { %p43_p10 = scmp.ne.s32.totalorder %s1630_s19, %s1626_s18  ;;  %p151_p13 = scmp.eq.s32.totalorder %s1706_s25, 1 }
  0x19   : > { %s1754_s30 = scalar_select %p28_p7, %s1634_s20, %s30_s29  }
  0x1a   : > { %p1756_p11 = por %p38_p9, %p37_p8  ;;  %p1762_p12 = por %p44_p1, %p43_p10 }
  0x1b   : > { %p157_p0 = scmp.eq.s32.totalorder %s1203_s24, 1  ;;  %p1364_p2 = scmp.lt.s32.totalorder %s1638_s21, 2 }
  0x1c   : > { %s225_s8 = sand.u32 1, %s1634_s20   ;;  %p1769_p5 = por %p151_p13, %p37_p8 }
  0x1d   : > { %p1773_p6 = por %p157_p0, %p43_p10  ;;  %s1210_s11 = sshll.u32 %s225_s8, 4 }
  0x1e   : > { %s1233_s12 = sshll.u32 %s1638_s21, 4  ;;  %s229_s16 = scalar_lea.vmem [#allocation3], %s1210_s11 }
  0x1f   : > { %s234_s15 = scalar_lea.hbm %s2428_s0, %s1233_s12  ;;  %s238_s17 = sshll.u32 %s229_s16, 4  ;;  %s239_s17 = int_to_ptr.vmem [resolvable:$true] %s238_s17 }
  0x20   : > { %s236_s22 = sshll.u32 %s234_s15, 4  ;;  %p1783_p7 = pnand %p1364_p2, %p1756_p11  ;;  %s237_s22 = int_to_ptr.hbm [resolvable:$true] %s236_s22 }
  0x21   : > { %s226_s24 = scalar_lea.sflag [#allocation4], %s225_s8  ;;  %s1534_s28 = sshra.s32 %s237_s22, 4  ;;  %s1535_s28 = int_to_ptr.hbm [resolvable:$true] %s1534_s28 }
  0x22   : > { %s1536_s29 = scalar_lea.hbm %s1535_s28, 16  ;;  %p1538_p9 = pneg %p1783_p7 }
  0x23   : > { %p1537_p8 = scmp.ne.s32.totalorder %s1535_s28, %s1536_s29  ;;  %s1541_s13 = scalar_lea.hbm %s2428_s0, 32 }
  0x24   : > { %p1542_p11 = scmp.lt.s32.totalorder %s1535_s28, %s2428_s0  ;;  %p1543_p0 = scmp.lt.s32.totalorder %s1541_s13, %s1536_s29 }
  0x25   : > { %p1539_p10 = pnand %p1538_p9, %p1537_p8 }
  0x26   : > { %p1544_p2 = por %p1543_p0, %p1542_p11 }
  0x27   : > { %p1540_p13 = pneg %p1539_p10 }
  0x29   : > { %p1545_p4 = pnand %p1544_p2, %p1540_p13 }
  0x2b   : > { %1548 = shalt.err (!%p1545_p4)
}
  0x2c   : > { %1355 = dma.hbm_to_vmem [thread:$0]  (!%p1783_p7), %s237_s22, 256, %s239_s17, %s226_s24  }
  0x2d   : > { %247 = sbr.rel (%p1711_p3) target bundleno = 1095 (0x447), region = 40  ;;  %s1800_s8 = sand.u32 (!%p1711_p3), 1, %s1630_s19  }
  0x2e   : > { %s1214_s15 = sshll.u32 (!%p1711_p3), %s1800_s8, 4  ;;  %s250_s16 = scalar_lea.sflag (!%p1711_p3), [#allocation4], %s1800_s8 }
  0x2f   : > { %s253_s28 = scalar_lea.vmem (!%p1711_p3), [#allocation3], %s1214_s15 }
  0x32   : > { %1609 = dma.done.wait (%p1762_p12), %s250_s16, 256  }
  0x33   : > { %1611 = vsyncadd (%p1762_p12), %s250_s16, 4294967040 }
  0x34   : > { %1613 = dma.done.wait (%p44_p1), [#allocation7], 384  }
  0x35   : > { %1615 = vsyncadd (%p44_p1), [#allocation7], 4294966912 }
  0x36   : > { %1617 = dma.done.wait (%p44_p1), [#allocation10], 384  }
  0x37   : > { %1619 = vsyncadd (%p44_p1), [#allocation10], 4294966912  ;;  %v1818_v0 = vld [vmem:[%s253_s28] sm:$0xff]  ;;  %s1644_s26 = smov 112   ;;  %s1645_s7 = smov 111   ;;  %v1826_v1 = vld [vmem:[%s253_s28 + $0x8] sm:$0xff]  ;;  %v301_v2 = vlaneseq }
  0x38   : > { %416 = vrot.lane.b32.xlu1 %v1818_v0, %s1644_s26  ;;  %431 = vrot.lane.b32.xlu0 %v1818_v0, %s1645_s7  ;;  %s1646_s17 = smov 113   ;;  %s1647_s22 = smov 127   ;;  %v446_v45 = vld [vmem:[#allocation6] sm:$0xff] }
  0x39   : > { %401 = vrot.lane.b32.xlu2 %v1818_v0, %s1646_s17  ;;  %s1648_s23 = smov 1   ;;  %s1649_s24 = smov 15   ;;  %v1854_v3 = vand.u32 127, %v301_v2 }
  0x3a   : > { %s1650_s29 = smov 16   ;;  %s1651_s11 = smov 17  }
  0x3b   : > { %v1857_v5 = vadd.s32 128, %v1854_v3  ;;  %v304_v9 = vand.u32 15, %v1854_v3  ;;  %vm2436_vm2 = vcmp.lt.s32.totalorder %v1854_v3, 111  ;;  %vm2435_vm6 = vcmp.lt.s32.totalorder %v1854_v3, 112  ;;  %s1234_s12 = sshll.u32 %s1706_s25, 4  ;;  %s300_s16 = scalar_lea.vmem [#allocation12], %s1214_s15 }
  0x3c   : > { %vm405_vm7 = vcmp.lt.s32.totalorder %v1854_v3, 113  ;;  %vm390_vm10 = vcmp.lt.s32.totalorder %v1854_v3, 127  ;;  %vm373_vm11 = vcmp.lt.s32.totalorder %v1854_v3, 1  ;;  %vm306_vm12 = vcmp.ge.s32.totalorder %v1854_v3, 16  ;;  %s1090_s6 = scalar_lea.hbm %s2433_s5, %s1234_s12  ;;  %s1092_s28 = sshll.u32 %s300_s16, 4  ;;  %s1093_s28 = int_to_ptr.vmem [resolvable:$true] %s1092_s28 }
  0x3d   : > { %v305_v8 = vand.u32 15, %v1857_v5  ;;  %vm2434_vm1 = vcmp.lt.s32.totalorder %v1857_v5, 240  ;;  %vm1867_vm3 = vcmp.le.s32.totalorder %v304_v9, 14  ;;  %vm1907_vm8 = vcmp.ge.s32.totalorder %v304_v9, 1  ;;  %s1079_s25 = scalar_lea.sflag [#allocation5], %s1800_s8  ;;  %s1584_s15 = scalar_lea.hbm %s2433_s5, 32 }
  0x3e   : > { %vm2439_vm13 = vcmp.lt.s32.totalorder %v1854_v3, 15  ;;  %vm1969_vm14 = vmand %vm306_vm12, %vm1867_vm3  ;;  %vm2438_vm15 = vcmp.lt.s32.totalorder %v1854_v3, 16 }
  0x3f   : > { %vm1861_vm0 = vcmp.le.s32.totalorder %v305_v8, 14  ;;  %vm1879_vm5 = vcmp.ge.s32.totalorder %v305_v8, 1 }
  0x40   : > { %418 = vrot.lane.b32.xlu1 %v1826_v1, %s1644_s26  ;;  %433 = vrot.lane.b32.xlu0 %v1826_v1, %s1645_s7  ;;  %vm1875_vm4 = vmand %vm2434_vm1, %vm1861_vm0 }
  0x41   : > { %403 = vrot.lane.b32.xlu2 %v1826_v1, %s1646_s17  ;;  %vm1915_vm9 = vmand %vm2434_vm1, %vm1879_vm5 }
  0x48   : > { %388 = vrot.lane.b32.xlu1 %v1826_v1, %s1647_s22  ;;  %386 = vrot.lane.b32.xlu0 %v1818_v0, %s1647_s22 }
  0x49   : > { %369 = vrot.lane.b32.xlu2 %v1818_v0, %s1648_s23 }
  0x50   : > { %354 = vrot.lane.b32.xlu1 %v1818_v0, %s1649_s24  ;;  %371 = vrot.lane.b32.xlu0 %v1826_v1, %s1648_s23 }
  0x51   : > { %356 = vrot.lane.b32.xlu2 %v1826_v1, %s1649_s24 }
  0x58   : > { %341 = vrot.lane.b32.xlu1 %v1826_v1, %s1650_s29  ;;  %339 = vrot.lane.b32.xlu0 %v1818_v0, %s1650_s29 }
  0x59   : > { %324 = vrot.lane.b32.xlu2 %v1818_v0, %s1651_s11 }
  0x60   : > { %326 = vrot.lane.b32.xlu0 %v1826_v1, %s1651_s11 }
  0x93   : > { %v402_v4 = vpop.permute.xlu2 %401 }
  0x9b   : > { %v404_v10 = vpop.permute.xlu2 %403 }
  0x9c   : > { %v1925_v24 = vsel %vm405_vm7, %v402_v4, %v404_v10  ;;  %v1929_v25 = vsel %vm405_vm7, %v404_v10, %v402_v4 }
  0xa3   : > { %v370_v23 = vpop.permute.xlu2 %369 }
  0xaa   : > { %v417_v6 = vpop.permute.xlu1 %416  ;;  %v432_v7 = vpop.permute.xlu0 %431 }
  0xab   : > { %v357_v30 = vpop.permute.xlu2 %356 }
  0xb2   : > { %v419_v14 = vpop.permute.xlu1 %418  ;;  %v434_v15 = vpop.permute.xlu0 %433 }
  0xb3   : > { %v1886_v17 = vsel %vm2436_vm2, %v432_v7, %v434_v15  ;;  %v1890_v18 = vsel %vm2436_vm2, %v434_v15, %v432_v7  ;;  %v1901_v19 = vsel %vm2435_vm6, %v417_v6, %v419_v14  ;;  %v1905_v20 = vsel %vm2435_vm6, %v419_v14, %v417_v6  ;;  %v325_v42 = vpop.permute.xlu2 %324  ;;  %vm2011_vm6 = vmand %vm306_vm12, %vm1907_vm8 }
  0xb4   : > { %1235 = vmatpush.msk.msra.mxu0 %vm1867_vm3, %v1886_v17  ;;  %1242 = vmatpush.msk.msra.mxu1 %vm1875_vm4, %v1890_v18  ;;  %vm465_vm2 = vcmask 588800  }
  0xb6   : > { %477 = vmatpush.msra.mxu0 %v1901_v19  ;;  %1243 = vmatpush.msk.msra.mxu1 %vm2434_vm1, %v1905_v20  ;;  %vm2437_vm1 = vcmp.lt.s32.totalorder %v1854_v3, 17 }
  0xb8   : > { %1236 = vmatpush.msk.msra.mxu0 %vm1907_vm8, %v1925_v24  ;;  %1244 = vmatpush.msk.msra.mxu1 %vm1915_vm9, %v1929_v25 }
  0xba   : > { %v389_v26 = vpop.permute.xlu1 %388  ;;  %v387_v27 = vpop.permute.xlu0 %386 }
  0xbb   : > { %v1940_v28 = vsel %vm390_vm10, %v387_v27, %v389_v26  ;;  %v1944_v29 = vsel %vm390_vm10, %v389_v26, %v387_v27  ;;  %v594_v27 = vld [vmem:[#allocation8 + $0x8] sm:$0xff] }
  0xbc   : > { %1237 = vmatpush.msk.msra.mxu0 %vm1867_vm3, %v1940_v28  ;;  %1245 = vmatpush.msk.msra.mxu1 %vm1861_vm0, %v1944_v29 }
  0xbe   : > { %480 = vmatpush.msra.mxu0 %v1818_v0  ;;  %500 = vmatpush.msra.mxu1 %v1826_v1 }
  0xc2   : > { %v355_v31 = vpop.permute.xlu1 %354  ;;  %v372_v32 = vpop.permute.xlu0 %371 }
  0xc3   : > { %v1959_v33 = vsel %vm373_vm11, %v372_v32, %v370_v23  ;;  %v1963_v34 = vsel %vm373_vm11, %v370_v23, %v372_v32  ;;  %v1975_v36 = vsel %vm2439_vm13, %v357_v30, %v355_v31  ;;  %v1979_v37 = vsel %vm2439_vm13, %v355_v31, %v357_v30  ;;  %v593_v31 = vld [vmem:[#allocation8] sm:$0xff] }
  0xc4   : > { %1238 = vmatpush.msk.msra.mxu0 %vm1907_vm8, %v1959_v33  ;;  %1246 = vmatpush.msk.msra.mxu1 %vm1879_vm5, %v1963_v34 }
  0xc6   : > { %1239 = vmatpush.msk.msra.mxu0 %vm1969_vm14, %v1975_v36  ;;  %1247 = vmatpush.msk.msra.mxu1 %vm1861_vm0, %v1979_v37 }
  0xca   : > { %v342_v38 = vpop.permute.xlu1 %341  ;;  %v340_v39 = vpop.permute.xlu0 %339 }
  0xcb   : > { %v1996_v40 = vsel %vm2438_vm15, %v342_v38, %v340_v39  ;;  %v2000_v41 = vsel %vm2438_vm15, %v340_v39, %v342_v38 }
  0xcc   : > { %1240 = vmatpush.msk.msra.mxu0 %vm306_vm12, %v1996_v40  ;;  %503 = vmatpush.msra.mxu1 %v2000_v41 }
  0xd2   : > { %v327_v44 = vpop.permute.xlu0 %326 }
  0xd3   : > { %v2017_v46 = vsel %vm2437_vm1, %v327_v44, %v325_v42  ;;  %v2021_v47 = vsel %vm2437_vm1, %v325_v42, %v327_v44 }
  0xd4   : > { %1241 = vmatpush.msk.msra.mxu0 %vm2011_vm6, %v2017_v46  ;;  %1248 = vmatpush.msk.msra.mxu1 %vm1879_vm5, %v2021_v47 }
  0xd5   : > { %1220 = vmatmul.msk.f32.vlgmr.msra.gmra.mxu0 %vm465_vm2, %v446_v45  ;;  %1221 = vmatmul.msk.f32.vlgmr.msra.gmra.mxu1 %vm465_vm2, %v446_v45  ;;  %vm2463_vm2 = vcmp.lt.s32.totalorder %v1854_v3, 111 }
 0x152   : > { %v486_v48 = vpop.f32.mrf.mxu0  ;;  %v506_v49 = vpop.f32.mrf.mxu1 }
 0x153   : > { %v2029_v50 = vmax.f32 %v486_v48, 0.0  ;;  %v2031_v51 = vmax.f32 %v506_v49, 0.0 }
 0x155   : > { %553 = vrot.lane.b32.xlu0 %v2029_v50, %s1647_s22  ;;  %563 = vrot.lane.b32.xlu1 %v2029_v50, %s1646_s17 }
 0x156   : > { %565 = vrot.lane.b32.xlu2 %v2031_v51, %s1646_s17 }
 0x15d   : > { %543 = vrot.lane.b32.xlu0 %v2031_v51, %s1648_s23  ;;  %555 = vrot.lane.b32.xlu1 %v2031_v51, %s1647_s22 }
 0x15e   : > { %541 = vrot.lane.b32.xlu2 %v2029_v50, %s1648_s23 }
 0x165   : > { %521 = vrot.lane.b32.xlu0 %v2029_v50, %s1650_s29  ;;  %531 = vrot.lane.b32.xlu1 %v2029_v50, %s1649_s24 }
 0x166   : > { %533 = vrot.lane.b32.xlu2 %v2031_v51, %s1649_s24 }
 0x16d   : > { %513 = vrot.lane.b32.xlu0 %v2031_v51, %s1651_s11  ;;  %523 = vrot.lane.b32.xlu1 %v2031_v51, %s1650_s29 }
 0x16e   : > { %511 = vrot.lane.b32.xlu2 %v2029_v50, %s1651_s11 }
 0x175   : > { %573 = vrot.lane.b32.xlu0 %v2029_v50, %s1644_s26  ;;  %583 = vrot.lane.b32.xlu1 %v2029_v50, %s1645_s7 }
 0x176   : > { %585 = vrot.lane.b32.xlu2 %v2031_v51, %s1645_s7 }
 0x17d   : > { %575 = vrot.lane.b32.xlu1 %v2031_v51, %s1644_s26 }
 0x1b0   : > { %v566_v52 = vpop.permute.xlu2 %565 }
 0x1b8   : > { %v2069_v56 = vpop.permute.xlu2 %541 }
 0x1c0   : > { %v2084_v60 = vpop.permute.xlu2 %533 }
 0x1c7   : > { %v2065_v53 = vpop.permute.xlu0 %553  ;;  %v564_v54 = vpop.permute.xlu1 %563 }
 0x1c8   : > { %v567_v55 = vsel %vm405_vm7, %v564_v54, %v566_v52  ;;  %v512_v4 = vpop.permute.xlu2 %511 }
 0x1c9   : > { %1249 = vmatpush.msk.msra.mxu2 %vm1907_vm8, %v567_v55  ;;  %1277 = vmatpush.msk.msrb.mxu1 %vm1907_vm8, %v567_v55  ;;  %v799_v55 = vld [vmem:[#allocation9] sm:$0xff] }
 0x1cf   : > { %v2075_v57 = vpop.permute.xlu0 %543  ;;  %v556_v58 = vpop.permute.xlu1 %555 }
 0x1d0   : > { %v557_v59 = vsel %vm390_vm10, %v2065_v53, %v556_v58  ;;  %v546_v61 = vsel %vm373_vm11, %v2075_v57, %v2069_v56  ;;  %v586_v10 = vpop.permute.xlu2 %585  ;;  %v558_v30 = vsel %vm390_vm10, %v556_v58, %v2065_v53  ;;  %v545_v32 = vsel %vm373_vm11, %v2069_v56, %v2075_v57 }
 0x1d1   : > { %1250 = vmatpush.msk.msra.mxu2 %vm1867_vm3, %v557_v59  ;;  %1278 = vmatpush.msk.msrb.mxu1 %vm1867_vm3, %v557_v59 }
 0x1d3   : > { %637 = vmatpush.msra.mxu2 %v2029_v50  ;;  %861 = vmatpush.msrb.mxu1 %v2029_v50 }
 0x1d5   : > { %1251 = vmatpush.msk.msra.mxu2 %vm1907_vm8, %v546_v61  ;;  %1279 = vmatpush.msk.msrb.mxu1 %vm1907_vm8, %v546_v61 }
 0x1d7   : > { %v2096_v62 = vpop.permute.xlu0 %521  ;;  %v532_v63 = vpop.permute.xlu1 %531 }
 0x1d8   : > { %v536_v2 = vsel %vm2439_vm13, %v2084_v60, %v532_v63  ;;  %vm2467_vm13 = vcmp.lt.s32.totalorder %v1857_v5, 240 }
 0x1d9   : > { %1252 = vmatpush.msk.msra.mxu2 %vm1969_vm14, %v536_v2  ;;  %1280 = vmatpush.msk.msrb.mxu1 %vm1969_vm14, %v536_v2 }
 0x1df   : > { %v514_v6 = vpop.permute.xlu0 %513  ;;  %v524_v7 = vpop.permute.xlu1 %523 }
 0x1e0   : > { %v526_v8 = vsel %vm2438_vm15, %v524_v7, %v2096_v62  ;;  %v516_v9 = vsel %vm2437_vm1, %v514_v6, %v512_v4  ;;  %vm2464_vm1 = vmmov %vm2463_vm2  ;;  %vm631_vm15 = vcmask 130048  }
 0x1e1   : > { %1253 = vmatpush.msk.msra.mxu2 %vm306_vm12, %v526_v8  ;;  %1281 = vmatpush.msk.msrb.mxu1 %vm306_vm12, %v526_v8 }
 0x1e3   : > { %1254 = vmatpush.msk.msra.mxu2 %vm2011_vm6, %v516_v9  ;;  %1282 = vmatpush.msk.msrb.mxu1 %vm2011_vm6, %v516_v9 }
 0x1e5   : > { %1255 = vmatpush.msk.msra.mxu2 %vm1867_vm3, %v1886_v17  ;;  %1283 = vmatpush.msk.msrb.mxu1 %vm1867_vm3, %v1886_v17 }
 0x1e7   : > { %v584_v14 = vpop.permute.xlu1 %583  ;;  %643 = vmatpush.msra.mxu2 %v1901_v19  ;;  %867 = vmatpush.msrb.mxu1 %v1901_v19  ;;  %v574_v17 = vpop.permute.xlu0 %573 }
 0x1e8   : > { %v2128_v15 = vsel %vm2463_vm2, %v584_v14, %v586_v10  ;;  %v2132_v23 = vsel %vm2464_vm1, %v586_v10, %v584_v14  ;;  %vm2465_vm1 = vcmp.lt.s32.totalorder %v1854_v3, 112 }
 0x1e9   : > { %1256 = vmatpush.msk.msra.mxu2 %vm1907_vm8, %v1925_v24  ;;  %1262 = vmatpush.msk.msra.mxu3 %vm1867_vm3, %v2128_v15  ;;  %vm2466_vm2 = vmmov %vm2465_vm1 }
 0x1ea   : > { %1275 = vmatpush.msk.msrb.mxu0 %vm1875_vm4, %v2132_v23  ;;  %1284 = vmatpush.msk.msrb.mxu1 %vm1907_vm8, %v1925_v24 }
 0x1eb   : > { %1257 = vmatpush.msk.msra.mxu2 %vm1867_vm3, %v1940_v28 }
 0x1ec   : > { %1285 = vmatpush.msk.msrb.mxu1 %vm1867_vm3, %v1940_v28  ;;  %v568_v28 = vsel %vm405_vm7, %v566_v52, %v564_v54 }
 0x1ed   : > { %646 = vmatpush.msra.mxu2 %v1818_v0 }
 0x1ee   : > { %870 = vmatpush.msrb.mxu1 %v1818_v0 }
 0x1ef   : > { %v576_v19 = vpop.permute.xlu1 %575  ;;  %1258 = vmatpush.msk.msra.mxu2 %vm1907_vm8, %v1959_v33 }
 0x1f0   : > { %1286 = vmatpush.msk.msrb.mxu1 %vm1907_vm8, %v1959_v33  ;;  %v2162_v24 = vsel %vm2465_vm1, %v574_v17, %v576_v19  ;;  %v2166_v26 = vsel %vm2466_vm2, %v576_v19, %v574_v17  ;;  %vm2469_vm1 = vcmp.lt.s32.totalorder %v1854_v3, 16  ;;  %vm2471_vm2 = vcmp.lt.s32.totalorder %v1857_v5, 240  ;;  %v800_v19 = vld [vmem:[#allocation9 + $0x8] sm:$0xff] }
 0x1f1   : > { %1259 = vmatpush.msk.msra.mxu2 %vm1969_vm14, %v1975_v36  ;;  %670 = vmatpush.msra.mxu3 %v2162_v24 }
 0x1f2   : > { %1276 = vmatpush.msk.msrb.mxu0 %vm2467_vm13, %v2166_v26  ;;  %1287 = vmatpush.msk.msrb.mxu1 %vm1969_vm14, %v1975_v36  ;;  %vm2468_vm13 = vcmp.lt.s32.totalorder %v1854_v3, 15  ;;  %v525_v36 = vsel %vm2469_vm1, %v2096_v62, %v524_v7  ;;  %vm2473_vm1 = vcmp.lt.s32.totalorder %v1854_v3, 111 }
 0x1f3   : > { %1263 = vmatpush.msk.msrb.mxu3 %vm1915_vm9, %v568_v28  ;;  %1260 = vmatpush.msk.msra.mxu2 %vm306_vm12, %v1996_v40  ;;  %v535_v33 = vsel %vm2468_vm13, %v532_v63, %v2084_v60  ;;  %vm2472_vm13 = vmmov %vm2471_vm2 }
 0x1f4   : > { %1288 = vmatpush.msk.msrb.mxu1 %vm306_vm12, %v1996_v40  ;;  %1222 = vmatmul.msk.f32.vlgmr.msra.gmra.mxu3 %vm631_vm15, %v594_v27 }
 0x1f5   : > { %1264 = vmatpush.msk.msrb.mxu3 %vm1861_vm0, %v558_v30  ;;  %1261 = vmatpush.msk.msra.mxu2 %vm2011_vm6, %v2017_v46 }
 0x1f6   : > { %1289 = vmatpush.msk.msrb.mxu1 %vm2011_vm6, %v2017_v46  ;;  %651 = vmatmul.f32.vlgmr.msra.gmra.mxu2 %v593_v31 }
 0x1f7   : > { %1298 = vmatpush.msk.msrb.mxu2 %vm1915_vm9, %v568_v28  ;;  %677 = vmatpush.msrb.mxu3 %v2031_v51 }
 0x1f8   : > { %1223 = vmatmul.msk.f32.vlgmr.msrb.gmra.mxu0 %vm631_vm15, %v594_v27  ;;  %vm2470_vm15 = vcmp.lt.s32.totalorder %v1854_v3, 17  ;;  %875 = vmatmul.f32.vlgmr.msrb.gmra.mxu1 %v799_v55 }
 0x1f9   : > { %1299 = vmatpush.msk.msrb.mxu2 %vm1861_vm0, %v558_v30  ;;  %1265 = vmatpush.msk.msrb.mxu3 %vm1879_vm5, %v545_v32  ;;  %v515_v38 = vsel %vm2470_vm15, %v512_v4, %v514_v6  ;;  %vm2474_vm15 = vmmov %vm2473_vm1 }
 0x1fb   : > { %901 = vmatpush.msrb.mxu2 %v2031_v51  ;;  %1266 = vmatpush.msk.msrb.mxu3 %vm1861_vm0, %v535_v33 }
 0x1fd   : > { %1300 = vmatpush.msk.msrb.mxu2 %vm1879_vm5, %v545_v32  ;;  %680 = vmatpush.msrb.mxu3 %v525_v36 }
 0x1ff   : > { %1301 = vmatpush.msk.msrb.mxu2 %vm1861_vm0, %v535_v33  ;;  %1267 = vmatpush.msk.msrb.mxu3 %vm1879_vm5, %v515_v38 }
 0x201   : > { %904 = vmatpush.msrb.mxu2 %v525_v36  ;;  %1268 = vmatpush.msk.msrb.mxu3 %vm1875_vm4, %v1890_v18 }
 0x203   : > { %1302 = vmatpush.msk.msrb.mxu2 %vm1879_vm5, %v515_v38  ;;  %1269 = vmatpush.msk.msrb.mxu3 %vm2471_vm2, %v1905_v20  ;;  %vm2475_vm2 = vcmp.lt.s32.totalorder %v1854_v3, 112 }
 0x205   : > { %1303 = vmatpush.msk.msrb.mxu2 %vm1875_vm4, %v1890_v18  ;;  %1270 = vmatpush.msk.msrb.mxu3 %vm1915_vm9, %v1929_v25 }
 0x207   : > { %1304 = vmatpush.msk.msrb.mxu2 %vm2472_vm13, %v1905_v20  ;;  %1271 = vmatpush.msk.msrb.mxu3 %vm1861_vm0, %v1944_v29  ;;  %vm2476_vm13 = vmmov %vm2475_vm2 }
 0x209   : > { %1305 = vmatpush.msk.msrb.mxu2 %vm1915_vm9, %v1929_v25  ;;  %686 = vmatpush.msrb.mxu3 %v1826_v1 }
 0x20b   : > { %1306 = vmatpush.msk.msrb.mxu2 %vm1861_vm0, %v1944_v29  ;;  %1272 = vmatpush.msk.msrb.mxu3 %vm1879_vm5, %v1963_v34 }
 0x20d   : > { %910 = vmatpush.msrb.mxu2 %v1826_v1  ;;  %1273 = vmatpush.msk.msrb.mxu3 %vm1861_vm0, %v1979_v37 }
 0x20f   : > { %1307 = vmatpush.msk.msrb.mxu2 %vm1879_vm5, %v1963_v34  ;;  %689 = vmatpush.msrb.mxu3 %v2000_v41 }
 0x211   : > { %1308 = vmatpush.msk.msrb.mxu2 %vm1861_vm0, %v1979_v37  ;;  %1274 = vmatpush.msk.msrb.mxu3 %vm1879_vm5, %v2021_v47 }
 0x212   : > { %691 = vmatmul.f32.vlgmr.msrb.gmra.mxu3 %v593_v31 }
 0x213   : > { %913 = vmatpush.msrb.mxu2 %v2000_v41 }
 0x215   : > { %1309 = vmatpush.msk.msrb.mxu2 %vm1879_vm5, %v2021_v47 }
 0x216   : > { %915 = vmatmul.f32.vlgmr.msrb.gmra.mxu2 %v799_v55 }
 0x275   : > { %v712_v34 = vpop.f32.mrf.mxu0 }
 0x277   : > { %v672_v18 = vpop.f32.mrf.mxu3 }
 0x279   : > { %v652_v20 = vpop.f32.mrf.mxu2 }
 0x27a   : > { %v673_v25 = vadd.f32 %v672_v18, %v652_v20 }
 0x27c   : > { %v2277_v29 = vmax.f32 %v673_v25, 0.0 }
 0x27e   : > { %779 = vrot.lane.b32.xlu1 %v2277_v29, %s1644_s26  ;;  %789 = vrot.lane.b32.xlu2 %v2277_v29, %s1645_s7 }
 0x295   : > { %v692_v37 = vpop.f32.mrf.mxu3 }
 0x296   : > { %v713_v39 = vadd.f32 %v712_v34, %v692_v37 }
 0x298   : > { %v2283_v40 = vmax.f32 %v713_v39, 0.0 }
 0x299   : > { %v916_v12 = vpop.f32.mrf.mxu2 }
 0x29a   : > { %791 = vrot.lane.b32.xlu0 %v2283_v40, %s1645_s7  ;;  %771 = vrot.lane.b32.xlu1 %v2283_v40, %s1646_s17 }
 0x29b   : > { %781 = vrot.lane.b32.xlu2 %v2283_v40, %s1644_s26  ;;  %s1094_s26 = sshll.u32 %s1090_s6, 4  ;;  %s1095_s26 = int_to_ptr.hbm [resolvable:$true] %s1094_s26 }
 0x29c   : > { %s1578_s7 = sshra.s32 %s1095_s26, 4  ;;  %s1579_s7 = int_to_ptr.hbm [resolvable:$true] %s1578_s7 }
 0x29d   : > { %p1585_p12 = scmp.lt.s32.totalorder %s1579_s7, %s2433_s5 }
 0x2a2   : > { %769 = vrot.lane.b32.xlu0 %v2277_v29, %s1646_s17  ;;  %747 = vrot.lane.b32.xlu1 %v2277_v29, %s1648_s23  ;;  %s1580_s17 = scalar_lea.hbm %s1579_s7, 16 }
 0x2a3   : > { %759 = vrot.lane.b32.xlu2 %v2277_v29, %s1647_s22  ;;  %p1581_p1 = scmp.ne.s32.totalorder %s1579_s7, %s1580_s17  ;;  %p1586_p7 = scmp.lt.s32.totalorder %s1584_s15, %s1580_s17 }
 0x2a5   : > { %p1582_p3 = pnand %p1581_p1, %p1769_p5  ;;  %p1587_p8 = por %p1586_p7, %p1585_p12 }
 0x2a7   : > { %p1583_p4 = pneg %p1582_p3 }
 0x2a9   : > { %p1588_p9 = pnand %p1587_p8, %p1583_p4 }
 0x2aa   : > { %761 = vrot.lane.b32.xlu0 %v2283_v40, %s1647_s22  ;;  %739 = vrot.lane.b32.xlu1 %v2283_v40, %s1649_s24 }
 0x2ab   : > { %749 = vrot.lane.b32.xlu2 %v2283_v40, %s1648_s23 }
 0x2b2   : > { %737 = vrot.lane.b32.xlu0 %v2277_v29, %s1649_s24  ;;  %717 = vrot.lane.b32.xlu1 %v2277_v29, %s1651_s11 }
 0x2b3   : > { %727 = vrot.lane.b32.xlu2 %v2277_v29, %s1650_s29 }
 0x2ba   : > { %729 = vrot.lane.b32.xlu0 %v2283_v40, %s1650_s29 }
 0x2bb   : > { %719 = vrot.lane.b32.xlu2 %v2283_v40, %s1651_s11 }
 0x2d8   : > { %v790_v41 = vpop.permute.xlu2 %789 }
 0x2f0   : > { %v780_v42 = vpop.permute.xlu1 %779 }
 0x2f5   : > { %v782_v44 = vpop.permute.xlu2 %781 }
 0x2f6   : > { %v784_v49 = vsel %vm2475_vm2, %v782_v44, %v780_v42  ;;  %v783_v52 = vsel %vm2476_vm13, %v780_v42, %v782_v44 }
 0x2fd   : > { %v760_v53 = vpop.permute.xlu2 %759 }
 0x305   : > { %v750_v59 = vpop.permute.xlu2 %749 }
 0x30c   : > { %v792_v45 = vpop.permute.xlu0 %791  ;;  %v772_v48 = vpop.permute.xlu1 %771 }
 0x30d   : > { %v793_v46 = vsel %vm2473_vm1, %v790_v41, %v792_v45  ;;  %v794_v47 = vsel %vm2474_vm15, %v792_v45, %v790_v41  ;;  %vm2477_vm1 = vcmp.lt.s32.totalorder %v1857_v5, 240  ;;  %v728_v4 = vpop.permute.xlu2 %727 }
 0x30e   : > { %1290 = vmatpush.msk.msra.mxu0 %vm1867_vm3, %v793_v46  ;;  %1310 = vmatpush.msk.msra.mxu3 %vm1875_vm4, %v794_v47 }
 0x310   : > { %885 = vmatpush.msra.mxu0 %v783_v52  ;;  %1311 = vmatpush.msk.msra.mxu3 %vm2477_vm1, %v784_v49 }
 0x314   : > { %v770_v54 = vpop.permute.xlu0 %769  ;;  %v748_v58 = vpop.permute.xlu1 %747 }
 0x315   : > { %v773_v56 = vsel %vm405_vm7, %v770_v54, %v772_v48  ;;  %v774_v57 = vsel %vm405_vm7, %v772_v48, %v770_v54  ;;  %v751_v22 = vsel %vm373_vm11, %v748_v58, %v750_v59  ;;  %v752_v63 = vsel %vm373_vm11, %v750_v59, %v748_v58  ;;  %v720_v17 = vpop.permute.xlu2 %719 }
 0x316   : > { %1291 = vmatpush.msk.msra.mxu0 %vm1907_vm8, %v773_v56  ;;  %1312 = vmatpush.msk.msra.mxu3 %vm1915_vm9, %v774_v57  ;;  %vm2478_vm7 = vcmp.lt.s32.totalorder %v1854_v3, 15  ;;  %vm2482_vm11 = vcmp.lt.s32.totalorder %v1854_v3, 17 }
 0x317   : > { %vm2479_vm9 = vmmov %vm2478_vm7 }
 0x31c   : > { %v762_v60 = vpop.permute.xlu0 %761  ;;  %v740_v2 = vpop.permute.xlu1 %739 }
 0x31d   : > { %v763_v61 = vsel %vm390_vm10, %v760_v53, %v762_v60  ;;  %v764_v62 = vsel %vm390_vm10, %v762_v60, %v760_v53 }
 0x31e   : > { %1292 = vmatpush.msk.msra.mxu0 %vm1867_vm3, %v763_v61  ;;  %1313 = vmatpush.msk.msra.mxu3 %vm1861_vm0, %v764_v62 }
 0x320   : > { %888 = vmatpush.msra.mxu0 %v2277_v29  ;;  %928 = vmatpush.msra.mxu3 %v2283_v40 }
 0x322   : > { %1293 = vmatpush.msk.msra.mxu0 %vm1907_vm8, %v752_v63  ;;  %1314 = vmatpush.msk.msra.mxu3 %vm1879_vm5, %v751_v22  ;;  %vm2480_vm8 = vcmp.lt.s32.totalorder %v1854_v3, 16  ;;  %v876_v3 = vpop.f32.mrf.mxu1 }
 0x323   : > { %vm2481_vm10 = vmmov %vm2480_vm8 }
 0x324   : > { %v738_v6 = vpop.permute.xlu0 %737  ;;  %v718_v9 = vpop.permute.xlu1 %717 }
 0x325   : > { %v741_v7 = vsel %vm2478_vm7, %v738_v6, %v740_v2  ;;  %v742_v8 = vsel %vm2479_vm9, %v740_v2, %v738_v6  ;;  %v721_v35 = vsel %vm2482_vm11, %v718_v9, %v720_v17 }
 0x326   : > { %1294 = vmatpush.msk.msra.mxu0 %vm1969_vm14, %v742_v8  ;;  %1315 = vmatpush.msk.msra.mxu3 %vm1861_vm0, %v741_v7  ;;  %vm2483_vm14 = vmmov %vm2482_vm11  ;;  %vm855_vm0 = vcmask 719872  }
 0x327   : > { %v722_v11 = vsel %vm2483_vm14, %v720_v17, %v718_v9 }
 0x32c   : > { %v730_v21 = vpop.permute.xlu0 %729 }
 0x32d   : > { %v732_v10 = vsel %vm2480_vm8, %v730_v21, %v728_v4  ;;  %v731_v14 = vsel %vm2481_vm10, %v728_v4, %v730_v21 }
 0x32e   : > { %1295 = vmatpush.msk.msra.mxu0 %vm306_vm12, %v732_v10  ;;  %931 = vmatpush.msra.mxu3 %v731_v14  ;;  %vm2484_vm12 = vmmov %vm2477_vm1 }
 0x330   : > { %1296 = vmatpush.msk.msra.mxu0 %vm2011_vm6, %v722_v11  ;;  %1316 = vmatpush.msk.msra.mxu3 %vm1879_vm5, %v721_v35 }
 0x332   : > { %1297 = vmatpush.msk.msra.mxu0 %vm1867_vm3, %v2128_v15  ;;  %1317 = vmatpush.msk.msra.mxu3 %vm1875_vm4, %v2132_v23  ;;  %vm1032_vm3 = vcmask 261120  }
 0x334   : > { %894 = vmatpush.msra.mxu0 %v2162_v24  ;;  %1318 = vmatpush.msk.msra.mxu3 %vm2484_vm12, %v2166_v26  ;;  %v1031_v24 = vld [vmem:[#allocation11] sm:$0xff] }
 0x335   : > { %1224 = vmatmul.msk.f32.vlgmr.msra.gmra.mxu0 %vm855_vm0, %v800_v19  ;;  %1225 = vmatmul.msk.f32.vlgmr.msra.gmra.mxu3 %vm855_vm0, %v800_v19 }
 0x3b2   : > { %v896_v16 = vpop.f32.mrf.mxu0 }
 0x3b3   : > { %v897_v43 = vadd.f32 %v896_v16, %v876_v3 }
 0x3b5   : > { %v939_v27 = vmax.f32 %v897_v43, 0.0 }
 0x3b7   : > { %1048 = vmatpush.msrb.mxu0 %v939_v27 }
 0x3b8   : > { %v936_v15 = vpop.f32.mrf.mxu3 }
 0x3b9   : > { %v937_v13 = vadd.f32 %v936_v15, %v916_v12  ;;  %1049 = vmatpush.msrb.mxu0 %v2277_v29 }
 0x3bb   : > { %v940_v23 = vmax.f32 %v937_v13, 0.0  ;;  %1050 = vmatpush.msrb.mxu0 %v2029_v50 }
 0x3bd   : > { %1068 = vmatpush.msra.mxu1 %v940_v23  ;;  %1051 = vmatpush.msrb.mxu0 %v1818_v0 }
 0x3be   : > { %1226 = vmatmul.msk.f32.vlgmr.msrb.gmra.mxu0 %vm1032_vm3, %v1031_v24 }
 0x3bf   : > { %1069 = vmatpush.msra.mxu1 %v2283_v40 }
 0x3c1   : > { %1070 = vmatpush.msra.mxu1 %v2031_v51 }
 0x3c3   : > { %1071 = vmatpush.msra.mxu1 %v1826_v1 }
 0x3c4   : > { %1227 = vmatmul.msk.f32.vlgmr.msra.gmra.mxu1 %vm1032_vm3, %v1031_v24 }
 0x43b   : > { %v1053_v5 = vpop.f32.mrf.mxu0 }
 0x43c   : > { %v1054_v26 = vadd.f32 %v1053_v5, %v1818_v0 }
 0x43e   : > { %1076 = vst [vmem:[%s300_s16] sm:$0xff] %v1054_v26 }
 0x441   : > { %v1073_v50 = vpop.f32.mrf.mxu1 }
 0x442   : > { %v1074_v51 = vadd.f32 %v1073_v50, %v1826_v1 }
 0x444   : > { %1077 = vst [vmem:[%s300_s16 + $0x8] sm:$0xff] %v1074_v51 }
 0x445   : > { %1591 = shalt.err (!%p1588_p9)
}
 0x446   : > { %1337 = dma.vmem_to_hbm [thread:$0]  (%p1769_p5), %s1093_s28, 256, %s1095_s26, %s1079_s25  }
 0x447 PF: > { %s1106_s8 = sand.u32 1, %s1626_s18   ;;  %p2485_p10 = scmp.ge.s32.totalorder %s1638_s21, 2 }
 0x448   : > { %s1107_s11 = scalar_lea.sflag [#allocation5], %s1106_s8 }
 0x449   : > { %p1357_p13 = pnand %p2485_p10, %p1773_p6 }
 0x44b   : > { %p1358_p11 = pneg %p1357_p13 }
 0x44d   : > { %1621 = dma.done.wait (%p1358_p11), %s1107_s11, 256  }
 0x44e   : > { %1623 = vsyncadd (%p1358_p11), %s1107_s11, 4294967040  ;;  %p20_p0 = scmp.ge.s32.totalorder %s1743_s27, 4   ;;  %s2486_s18 = smov %s1630_s19 }
 0x44f   : > { %s2487_s19 = smov %s1634_s20  ;;  %s2488_s20 = smov %s1754_s30 }
 0x450   : > { %s2489_s21 = smov %s1743_s27  ;;  %22 = sbr.rel (!%p20_p0) target bundleno = 7 (0x7), region = 101 }
 0x455   :  { %1113 = vsyncpa [#allocation4], 1 }
 0x456   :  { %1115 = vsyncpa [#allocation4 + $0x1], 1 }
 0x457   :  { %1116 = vsyncpa [#allocation7], 1 }
 0x458   :  { %1117 = vsyncpa [#allocation10], 1 }
 0x459   :  { %1118 = vsyncpa [#allocation5], 1 }
 0x45a   :  { %1120 = vsyncpa [#allocation5 + $0x1], 1 }

</bundles_post_ra>
